<compile_context>
chip_gen: v6e
topology: v6e:2x2x1
jax: 0.10.0
libtpu: 0.0.40
codegen_flags: <defaults>
</compile_context>

<pallas_src>
import functools

import jax
import jax.numpy as jnp
from jax import lax
from jax.experimental import pallas as pl
from jax.experimental.pallas import tpu as pltpu


def _round_up(x, m):
    return (x + m - 1) // m * m


def _plan_hw_tiles(hw, batch, tile_pref):
    """Pick the spatial (lane) tile so blocks are multiples of 128 and the
    total grid step count stays >= 2 (v7x megacore)."""
    tile_pref = max(128, _round_up(int(tile_pref), 128))
    num = max(1, -(-hw // tile_pref))
    if batch * num < 2 and hw >= 256:
        num = 2
    tile = _round_up(-(-hw // num), 128)
    num = max(1, -(-hw // tile))
    if batch * num < 2 and hw >= 256:
        num = 2
    return tile, num, tile * num


def _vmem_limit_bytes(tile, n_e, e_dim):
    f32, lane = 4, 128
    io_per_step = (2 * e_dim * tile + tile) * f32           # z in + z_q out + idx out
    stats_per_step = (n_e * lane + 8 * lane) * f32          # counts + sse (lane-padded)
    resident = (2 * e_dim * n_e + n_e * lane) * f32         # emb + emb^T + ||e||^2
    temps = 2 * n_e * tile * f32                            # d + one-hot intermediates
    need = 2 * (io_per_step + stats_per_step + resident) + temps
    return int(min(max(need + (8 << 20), 32 << 20), 48 << 20))


def _vq_kernel(z_ref, embd_ref, embt_ref, esq_ref,
               zq_ref, idx_ref, cnt_ref, sse_ref,
               *, n_e, tile, hw_valid, need_mask):
    z = z_ref[0]                                    # (C, T)   f32
    emb_d = embd_ref[...]                           # (n_e, C) f32/bf16 (resident)
    emb_t = embt_ref[...]                           # (C, n_e) f32      (resident)
    e_sq = esq_ref[...]                             # (n_e, 1) f32      (resident)

    # d = ||e||^2 - 2 e.z   (||z||^2 is constant per column -> argmin unchanged)
    dots = jnp.dot(emb_d, z.astype(emb_d.dtype),
                   preferred_element_type=jnp.float32)        # MXU (n_e, T)
    d = e_sq - 2.0 * dots

    # First-occurrence argmin over the codebook axis (matches torch.argmin).
    min_d = jnp.min(d, axis=0, keepdims=True)                 # (1, T)
    row = lax.broadcasted_iota(jnp.int32, d.shape, 0)         # (n_e, T)
    idx = jnp.min(jnp.where(d == min_d, row, n_e),
                  axis=0, keepdims=True)                      # (1, T) int32

    # One-hot columns and the exact codebook gather (both on the MXU).
    enc = (row == idx).astype(jnp.float32)                    # (n_e, T)
    zq = jnp.dot(emb_t, enc, preferred_element_type=jnp.float32)   # (C, T)

    zq_ref[...] = zq[None]            # already NCHW layout, lane-dense store
    idx_ref[...] = idx[None]          # lane-dense int32 row

    # Fused reductions: per-tile code counts (-> perplexity) and per-tile
    # sum((z_q - z)^2) (-> loss).  Padded spatial columns are masked out.
    if need_mask:
        col = (pl.program_id(1) * tile
               + lax.broadcasted_iota(jnp.int32, (1, tile), 1))
        valid = (col < hw_valid).astype(jnp.float32)          # (1, T)
        enc_v = enc * valid
        diff = (zq - z) * valid
    else:
        enc_v = enc
        diff = zq - z

    cnt_ref[...] = jnp.sum(enc_v, axis=1, keepdims=True)[None]      # (1, n_e, 1)
    sse = jnp.sum(diff * diff)
    sse_ref[...] = jnp.broadcast_to(sse.reshape(1, 1, 1), (1, 8, 1))


def vector_quantizer_forward(z_nchw, emb_weight, beta, *,
                             tile_hw=2048, distance_in_bf16=False):
    """Forward pass of VectorQuantizer.

    z_nchw:     (B, C, H, W) float32, C == e_dim
    emb_weight: (n_e, e_dim) float32
    Returns (loss, z_q [NCHW], perplexity, min_encodings, min_encoding_indices)
    """
    B, C, H, W = z_nchw.shape
    n_e, e_dim = emb_weight.shape
    assert C == e_dim

    hw = H * W
    tile, num_hw, hw_pad = _plan_hw_tiles(hw, B, tile_hw)

    # NCHW kept as-is; merging H,W -> H*W is a free reshape (no relayout pass).
    z_r = z_nchw.astype(jnp.float32).reshape(B, C, hw)
    if hw_pad != hw:
        z_r = jnp.pad(z_r, ((0, 0), (0, 0), (0, hw_pad - hw)))

    emb = emb_weight.astype(jnp.float32)
    emb_t = emb.T                                       # (e_dim, n_e), hoisted
    e_sq = jnp.sum(emb * emb, axis=1, keepdims=True)    # (n_e, 1),    hoisted
    # TODO(synk): for v5e/v6e, also pass z as bf16 to halve the HBM read; kept
    # f32 here so the fused SSE/loss matches the f32 PyTorch module.
    emb_d = emb.astype(jnp.bfloat16) if distance_in_bf16 else emb

    kernel = functools.partial(_vq_kernel, n_e=n_e, tile=tile,
                               hw_valid=hw, need_mask=(hw_pad != hw))

    num_total = B * num_hw
    zq_p, idx_p, cnt_p, sse_p = pl.pallas_call(
        kernel,
        out_shape=(
            jax.ShapeDtypeStruct((B, C, hw_pad), jnp.float32),     # z_q (NCHW)
            jax.ShapeDtypeStruct((B, 1, hw_pad), jnp.int32),       # indices
            jax.ShapeDtypeStruct((num_total, n_e, 1), jnp.float32),  # counts
            jax.ShapeDtypeStruct((num_total, 8, 1), jnp.float32),    # sse
        ),
        grid_spec=pltpu.PrefetchScalarGridSpec(
            num_scalar_prefetch=0,
            grid=(B, num_hw),
            in_specs=[
                pl.BlockSpec((1, C, tile), lambda b, j: (b, 0, j)),   # z tile
                pl.BlockSpec((n_e, e_dim), lambda b, j: (0, 0)),      # emb   (resident)
                pl.BlockSpec((e_dim, n_e), lambda b, j: (0, 0)),      # emb^T (resident)
                pl.BlockSpec((n_e, 1), lambda b, j: (0, 0)),          # ||e||^2 (resident)
            ],
            out_specs=[
                pl.BlockSpec((1, C, tile), lambda b, j: (b, 0, j)),
                pl.BlockSpec((1, 1, tile), lambda b, j: (b, 0, j)),
                pl.BlockSpec((1, n_e, 1), lambda b, j: (b * num_hw + j, 0, 0)),
                pl.BlockSpec((1, 8, 1), lambda b, j: (b * num_hw + j, 0, 0)),
            ],
        ),
        compiler_params=pltpu.CompilerParams(
            dimension_semantics=("parallel", "parallel"),
            vmem_limit_bytes=_vmem_limit_bytes(tile, n_e, e_dim)),
    )(z_r, emb_d, emb_t, e_sq)

    if hw_pad != hw:
        zq = zq_p[:, :, :hw].reshape(B, C, H, W)
        idx_flat = idx_p[:, 0, :hw].reshape(-1)
    else:
        zq = zq_p.reshape(B, C, H, W)
        idx_flat = idx_p[:, 0, :].reshape(-1)

    N = B * hw
    min_encoding_indices = idx_flat.reshape(N, 1)
    # Dense one-hot reconstructed outside the kernel (only materialized if the
    # caller actually consumes it).
    min_encodings = jax.nn.one_hot(idx_flat, n_e, dtype=jnp.float32)

    # loss = mean((sg[z_q]-z)^2) + beta*mean((z_q-sg[z])^2) == (1+beta)*MSE fwd.
    sse = jnp.sum(sse_p[:, 0, 0])
    mse = sse / jnp.float32(N * e_dim)
    loss = (1.0 + beta) * mse

    counts = jnp.sum(cnt_p[:, :, 0], axis=0)               # (n_e,)
    e_mean = counts / jnp.float32(N)
    perplexity = jnp.exp(-jnp.sum(e_mean * jnp.log(e_mean + 1e-10)))

    # TODO(synk): straight-through estimator (z_q = z + sg[z_q - z]) and the
    # stop-gradient split of the two loss terms need a custom_vjp; forward
    # values here match the PyTorch module.
    return loss, zq, perplexity, min_encodings, min_encoding_indices


if __name__ == "__main__":
    # Module hyperparameters (small, TPU-tile friendly).
    n_e = 128      # number of codebook embeddings
    e_dim = 32     # embedding dimension == channel dim of z
    beta = 0.25

    B, H, W = 2, 24, 24        # N = B*H*W = 1152; H*W=576 exercises hw padding

    key = jax.random.PRNGKey(0)
    k_z, k_emb = jax.random.split(key)

    # Deterministic init like the PyTorch module: uniform(-1/n_e, 1/n_e).
    emb_weight = jax.random.uniform(
        k_emb, (n_e, e_dim), dtype=jnp.float32,
        minval=-1.0 / n_e, maxval=1.0 / n_e)
    z = jax.random.normal(k_z, (B, e_dim, H, W), dtype=jnp.float32)

    fwd = jax.jit(functools.partial(vector_quantizer_forward, beta=beta))
    loss, z_q, perplexity, min_encodings, min_encoding_indices = fwd(z, emb_weight)
    jax.block_until_ready((loss, z_q, perplexity, min_encodings,
                           min_encoding_indices))

    # --- sanity checks (tie-robust) -----------------------------------------
    assert z_q.shape == z.shape
    assert min_encodings.shape == (B * H * W, n_e)
    assert min_encoding_indices.shape == (B * H * W, 1)

    zf = jnp.transpose(z, (0, 2, 3, 1)).reshape(-1, e_dim)
    d_full = (jnp.sum(zf ** 2, axis=1, keepdims=True)
              + jnp.sum(emb_weight ** 2, axis=1)
              - 2.0 * zf @ emb_weight.T)
    idx_k = min_encoding_indices[:, 0]
    # Chosen code is (within fp tolerance) the nearest one.
    chosen_d = jnp.take_along_axis(d_full, idx_k[:, None], axis=1)[:, 0]
    assert bool(jnp.max(chosen_d - jnp.min(d_full, axis=1)) < 1e-4)
    # Internal consistency of the kernel outputs.
    zq_rows = jnp.transpose(z_q, (0, 2, 3, 1)).reshape(-1, e_dim)
    assert bool(jnp.allclose(zq_rows, emb_weight[idx_k], atol=1e-6))
    assert bool(jnp.all(min_encodings == jax.nn.one_hot(idx_k, n_e,
                                                        dtype=jnp.float32)))
    mse_chk = jnp.mean((zq_rows - zf) ** 2)
    assert bool(jnp.allclose(loss, (1.0 + beta) * mse_chk, rtol=1e-4, atol=1e-7))
    e_mean_chk = jnp.mean(min_encodings, axis=0)
    ppl_chk = jnp.exp(-jnp.sum(e_mean_chk * jnp.log(e_mean_chk + 1e-10)))
    assert bool(jnp.allclose(perplexity, ppl_chk, rtol=1e-4))

    print("KERNEL_OK")
</pallas_src>

<mosaic_0001>
module attributes {stable_mosaic.version = 11 : i64} {
  func.func @_vq_kernel(%arg0: i32, %arg1: i32, %arg2: memref<1x32x640xf32, #tpu.memory_space<vmem>>, %arg3: memref<128x32xf32, #tpu.memory_space<vmem>>, %arg4: memref<32x128xf32, #tpu.memory_space<vmem>>, %arg5: memref<128x1xf32, #tpu.memory_space<vmem>>, %arg6: memref<1x32x640xf32, #tpu.memory_space<vmem>>, %arg7: memref<1x1x640xi32, #tpu.memory_space<vmem>>, %arg8: memref<1x128x1xf32, #tpu.memory_space<vmem>>, %arg9: memref<1x8x1xf32, #tpu.memory_space<vmem>>) attributes {dimension_semantics = [#tpu.dimension_semantics<parallel>, #tpu.dimension_semantics<parallel>], iteration_bounds = array<i64: 2, 1>, scalar_prefetch = 0 : i64, scratch_operands = 0 : i64, tpu.core_type = #tpu.core_type<tc>, window_params = [{transform_indices = @transform_0, window_bounds = array<i64: 1, 32, 640>}, {pipeline_mode = #tpu.pipeline_mode<synchronous>, transform_indices = @transform_1, window_bounds = array<i64: 128, 32>}, {pipeline_mode = #tpu.pipeline_mode<synchronous>, transform_indices = @transform_2, window_bounds = array<i64: 32, 128>}, {pipeline_mode = #tpu.pipeline_mode<synchronous>, transform_indices = @transform_3, window_bounds = array<i64: 128, 1>}, {transform_indices = @transform_4, window_bounds = array<i64: 1, 32, 640>}, {transform_indices = @transform_5, window_bounds = array<i64: 1, 1, 640>}, {transform_indices = @transform_6, window_bounds = array<i64: 1, 128, 1>}, {transform_indices = @transform_7, window_bounds = array<i64: 1, 8, 1>}]} {
    %c0 = arith.constant 0 : index
    %c0_0 = arith.constant 0 : index
    %c0_1 = arith.constant 0 : index
    %0 = vector.load %arg2[%c0, %c0_0, %c0_1] : memref<1x32x640xf32, #tpu.memory_space<vmem>>, vector<1x32x640xf32>
    %1 = vector.shape_cast %0 : vector<1x32x640xf32> to vector<32x640xf32>
    %c0_2 = arith.constant 0 : index
    %c0_3 = arith.constant 0 : index
    %2 = vector.load %arg3[%c0_2, %c0_3] : memref<128x32xf32, #tpu.memory_space<vmem>>, vector<128x32xf32>
    %c0_4 = arith.constant 0 : index
    %c0_5 = arith.constant 0 : index
    %3 = vector.load %arg4[%c0_4, %c0_5] : memref<32x128xf32, #tpu.memory_space<vmem>>, vector<32x128xf32>
    %c0_6 = arith.constant 0 : index
    %c0_7 = arith.constant 0 : index
    %4 = vector.load %arg5[%c0_6, %c0_7] : memref<128x1xf32, #tpu.memory_space<vmem>>, vector<128x1xf32>
    %cst = arith.constant dense<0.000000e+00> : vector<128x640xf32>
    %5 = tpu.matmul %2, %1, %cst {dimension_numbers = #tpu.dot_dimension_numbers<[1], [0], [0], [1], [0, 0, 1, 1], [], []>} : vector<128x32xf32>, vector<32x640xf32>, vector<128x640xf32> -> vector<128x640xf32>
    %cst_8 = arith.constant 2.000000e+00 : f32
    %6 = vector.broadcast %cst_8 : f32 to vector<128x640xf32>
    %7 = arith.mulf %6, %5 : vector<128x640xf32>
    %8 = vector.broadcast %4 : vector<128x1xf32> to vector<128x640xf32>
    %9 = arith.subf %8, %7 : vector<128x640xf32>
    %cst_9 = arith.constant dense<0x7F800000> : vector<640xf32>
    %10 = vector.multi_reduction <minimumf>, %9, %cst_9 [0] : vector<128x640xf32> to vector<640xf32>
    %11 = vector.shape_cast %10 : vector<640xf32> to vector<1x640xf32>
    %12 = tpu.iota {dimensions = array<i32: 0>} : vector<128x640xi32>
    %13 = vector.broadcast %11 : vector<1x640xf32> to vector<128x640xf32>
    %14 = arith.cmpf oeq, %9, %13 : vector<128x640xf32>
    %c128_i32 = arith.constant 128 : i32
    %15 = vector.broadcast %c128_i32 : i32 to vector<128x640xi32>
    %16 = arith.select %14, %12, %15 : vector<128x640xi1>, vector<128x640xi32>
    %cst_10 = arith.constant dense<2147483647> : vector<640xi32>
    %17 = vector.multi_reduction <minsi>, %16, %cst_10 [0] : vector<128x640xi32> to vector<640xi32>
    %18 = vector.shape_cast %17 : vector<640xi32> to vector<1x640xi32>
    %19 = vector.broadcast %18 : vector<1x640xi32> to vector<128x640xi32>
    %20 = arith.cmpi eq, %12, %19 : vector<128x640xi32>
    %21 = arith.extui %20 : vector<128x640xi1> to vector<128x640xi32>
    %22 = arith.sitofp %21 : vector<128x640xi32> to vector<128x640xf32>
    %cst_11 = arith.constant dense<0.000000e+00> : vector<32x640xf32>
    %23 = tpu.matmul %3, %22, %cst_11 {dimension_numbers = #tpu.dot_dimension_numbers<[1], [0], [0], [1], [0, 0, 1, 1], [], []>} : vector<32x128xf32>, vector<128x640xf32>, vector<32x640xf32> -> vector<32x640xf32>
    %24 = vector.shape_cast %23 : vector<32x640xf32> to vector<1x32x640xf32>
    %c0_12 = arith.constant 0 : index
    %c0_13 = arith.constant 0 : index
    %c0_14 = arith.constant 0 : index
    %25 = vector.load %arg6[%c0_12, %c0_13, %c0_14] : memref<1x32x640xf32, #tpu.memory_space<vmem>>, vector<1x32x640xf32>
    tpu.vector_store %arg6[%c0_12, %c0_13, %c0_14], %24 {strides = array<i32>} : memref<1x32x640xf32, #tpu.memory_space<vmem>>, vector<1x32x640xf32>,
    %26 = vector.shape_cast %18 : vector<1x640xi32> to vector<1x1x640xi32>
    %c0_15 = arith.constant 0 : index
    %c0_16 = arith.constant 0 : index
    %c0_17 = arith.constant 0 : index
    %27 = vector.load %arg7[%c0_15, %c0_16, %c0_17] : memref<1x1x640xi32, #tpu.memory_space<vmem>>, vector<1x1x640xi32>
    tpu.vector_store %arg7[%c0_15, %c0_16, %c0_17], %26 {strides = array<i32>} : memref<1x1x640xi32, #tpu.memory_space<vmem>>, vector<1x1x640xi32>,
    %c640_i32 = arith.constant 640 : i32
    %28 = arith.muli %arg1, %c640_i32 : i32
    %29 = tpu.iota {dimensions = array<i32: 1>} : vector<1x640xi32>
    %30 = vector.broadcast %28 : i32 to vector<1x640xi32>
    %31 = arith.addi %30, %29 : vector<1x640xi32>
    %c576_i32 = arith.constant 576 : i32
    %32 = vector.broadcast %c576_i32 : i32 to vector<1x640xi32>
    %33 = arith.cmpi slt, %31, %32 : vector<1x640xi32>
    %34 = arith.extui %33 : vector<1x640xi1> to vector<1x640xi32>
    %35 = arith.sitofp %34 : vector<1x640xi32> to vector<1x640xf32>
    %36 = vector.broadcast %35 : vector<1x640xf32> to vector<128x640xf32>
    %37 = arith.mulf %22, %36 : vector<128x640xf32>
    %38 = arith.subf %23, %1 : vector<32x640xf32>
    %39 = vector.broadcast %35 : vector<1x640xf32> to vector<32x640xf32>
    %40 = arith.mulf %38, %39 : vector<32x640xf32>
    %cst_18 = arith.constant dense<0.000000e+00> : vector<128xf32>
    %41 = vector.multi_reduction <add>, %37, %cst_18 [1] : vector<128x640xf32> to vector<128xf32>
    %42 = vector.shape_cast %41 : vector<128xf32> to vector<128x1xf32>
    %43 = vector.shape_cast %42 : vector<128x1xf32> to vector<1x128x1xf32>
    %c0_19 = arith.constant 0 : index
    %c0_20 = arith.constant 0 : index
    %c0_21 = arith.constant 0 : index
    %44 = vector.load %arg8[%c0_19, %c0_20, %c0_21] : memref<1x128x1xf32, #tpu.memory_space<vmem>>, vector<1x128x1xf32>
    tpu.vector_store %arg8[%c0_19, %c0_20, %c0_21], %43 {strides = array<i32>} : memref<1x128x1xf32, #tpu.memory_space<vmem>>, vector<1x128x1xf32>,
    %45 = arith.mulf %40, %40 : vector<32x640xf32>
    %46 = vector.shape_cast %45 : vector<32x640xf32> to vector<1x32x640xf32>
    %cst_22 = arith.constant dense<0.000000e+00> : vector<1xf32>
    %47 = vector.multi_reduction <add>, %46, %cst_22 [1, 2] : vector<1x32x640xf32> to vector<1xf32>
    %48 = vector.shape_cast %47 : vector<1xf32> to vector<1x1x1xf32>
    %49 = vector.extract %48[0, 0, 0] : f32 from vector<1x1x1xf32>
    %50 = vector.broadcast %49 : f32 to vector<1x1x1xf32>
    %51 = vector.shape_cast %50 : vector<1x1x1xf32> to vector<1x1x1xf32>
    %52 = vector.broadcast %51 : vector<1x1x1xf32> to vector<1x8x1xf32>
    %c0_23 = arith.constant 0 : index
    %c0_24 = arith.constant 0 : index
    %c0_25 = arith.constant 0 : index
    %53 = vector.load %arg9[%c0_23, %c0_24, %c0_25] : memref<1x8x1xf32, #tpu.memory_space<vmem>>, vector<1x8x1xf32>
    tpu.vector_store %arg9[%c0_23, %c0_24, %c0_25], %52 {strides = array<i32>} : memref<1x8x1xf32, #tpu.memory_space<vmem>>, vector<1x8x1xf32>,
    return
  }
  func.func @transform_0(%arg0: i32, %arg1: i32) -> (i32, i32, i32) {
    %c0_i32 = arith.constant 0 : i32
    %c0_i32_0 = arith.constant 0 : i32
    return %arg0, %c0_i32, %arg1 : i32, i32, i32
  }
  func.func @transform_1(%arg0: i32, %arg1: i32) -> (i32, i32) {
    %c0_i32 = arith.constant 0 : i32
    %c0_i32_0 = arith.constant 0 : i32
    %c0_i32_1 = arith.constant 0 : i32
    return %c0_i32, %c0_i32_0 : i32, i32
  }
  func.func @transform_2(%arg0: i32, %arg1: i32) -> (i32, i32) {
    %c0_i32 = arith.constant 0 : i32
    %c0_i32_0 = arith.constant 0 : i32
    %c0_i32_1 = arith.constant 0 : i32
    return %c0_i32, %c0_i32_0 : i32, i32
  }
  func.func @transform_3(%arg0: i32, %arg1: i32) -> (i32, i32) {
    %c0_i32 = arith.constant 0 : i32
    %c0_i32_0 = arith.constant 0 : i32
    %c0_i32_1 = arith.constant 0 : i32
    return %c0_i32, %c0_i32_0 : i32, i32
  }
  func.func @transform_4(%arg0: i32, %arg1: i32) -> (i32, i32, i32) {
    %c0_i32 = arith.constant 0 : i32
    %c0_i32_0 = arith.constant 0 : i32
    return %arg0, %c0_i32, %arg1 : i32, i32, i32
  }
  func.func @transform_5(%arg0: i32, %arg1: i32) -> (i32, i32, i32) {
    %c0_i32 = arith.constant 0 : i32
    %c0_i32_0 = arith.constant 0 : i32
    return %arg0, %c0_i32, %arg1 : i32, i32, i32
  }
  func.func @transform_6(%arg0: i32, %arg1: i32) -> (i32, i32, i32) {
    %c1_i32 = arith.constant 1 : i32
    %0 = arith.muli %arg0, %c1_i32 : i32
    %1 = arith.addi %0, %arg1 : i32
    %c0_i32 = arith.constant 0 : i32
    %c0_i32_0 = arith.constant 0 : i32
    %c0_i32_1 = arith.constant 0 : i32
    return %1, %c0_i32, %c0_i32_0 : i32, i32, i32
  }
  func.func @transform_7(%arg0: i32, %arg1: i32) -> (i32, i32, i32) {
    %c1_i32 = arith.constant 1 : i32
    %0 = arith.muli %arg0, %c1_i32 : i32
    %1 = arith.addi %0, %arg1 : i32
    %c0_i32 = arith.constant 0 : i32
    %c0_i32_0 = arith.constant 0 : i32
    %c0_i32_1 = arith.constant 0 : i32
    return %1, %c0_i32, %c0_i32_0 : i32, i32, i32
  }
}

</mosaic_0001>

<bundles_post_ra>
// kernel: squeeze.5
= control target key start
LH: loop header
LB: loop body
LE: loop exit
PB: predicated region body
PF: predicated region fallthrough
CT: control target
= control target key end

     0   :  { %s207_s0 = inlined_call_operand.vmem [shape: s32[2,576], index: 0, kind: input, shape index: {}]   ;;  %s208_s1 = inlined_call_operand.hbm [shape: s32[1152,1], index: 1, kind: output, shape index: {}]  }
   0x1   :  { %v145_v0 = vld [vmem:[%s207_s0 + $0x8] sm:$0x3]  ;;  %v146_v1 = vld [vmem:[%s207_s0 + $0x6] sm:$0x3]  ;;  %v147_v2 = vld [vmem:[%s207_s0 + $0x4] sm:$0x3] }
   0x2   :  { %10 = vst [vmem:[#allocation3 + $0x20] sm:$0x3] %v145_v0  ;;  %15 = vst [vmem:[#allocation3 + $0x18] sm:$0x3] %v146_v1  ;;  %v148_v3 = vld [vmem:[%s207_s0 + $0x2] sm:$0x3] }
   0x3   :  { %20 = vst [vmem:[#allocation3 + $0x10] sm:$0x3] %v147_v2  ;;  %v25_v4 = vld [vmem:[%s207_s0] sm:$0x3]  ;;  %24 = vst [vmem:[#allocation3 + $0x8] sm:$0x3] %v148_v3 }
   0x4   :  { %26 = vst [vmem:[#allocation3] sm:$0x3] %v25_v4 }
   0x5   :  { %2 = vsyncpa [#allocation1], 0  ;;  %s35_s0 = smov 3  ;;  %s38_s16 = smov 12  ;;  %vm40_vm0 = vcmask 1043458   ;;  %vm29_vm1 = vcmask 523264  }
   0x6   :  { %vm46_vm2 = vcmask 1044484   ;;  %s173_s17 = smov 64   ;;  %vm57_vm3 = vcmask 1048064   ;;  %s174_s18 = smov [#allocation0]  }
   0x7   :  { %s129_s19 = sshll.u32 %s174_s18, 4  ;;  %s130_s19 = int_to_ptr.vmem [resolvable:$true] %s129_s19 }
   0x8   :  { %s151_s20 = scalar_lea.vmem %s130_s19, 144  ;;  %s155_s21 = scalar_lea.vmem %s130_s19, 160 }
   0x9   :  { %v28_v5 = vld [vmem:[#allocation3 + $0x20] sm:$0x1]   ;;  %v45_v6 = vld [vmem:[#allocation3 + $0x1d] sm:$0x10]   ;;  %p152_p0 = scmp.ne.s32.totalorder %s130_s19, %s151_s20  ;;  %p156_p1 = scmp.lt.s32.totalorder %s130_s19, %s130_s19 }
   0xa   :  { %31 = vst.msk [vmem:[#allocation2 + $0x20] sm:$0x1] %vm29_vm1, %v28_v5   ;;  %p157_p2 = scmp.lt.s32.totalorder %s155_s21, %s151_s20 }
   0xb   :  { %v36_v7 = vld [vmem:[#allocation3 + $0x19] ss:$-24 sm:%s35_s0]   ;;  %v32_v11 = vld [vmem:[#allocation3] ss:$8 sm:$0xf]  }
   0xc   :  { %v39_v8 = vld [vmem:[#allocation3 - $0x7] ss:$8 sm:%s38_s16]   ;;  %33 = vst [vmem:[#allocation2] ss:$8 sm:$0xf] %v32_v11   ;;  %p158_p3 = por %p157_p2, %p156_p1 }
   0xd   :  { %v41_v9 = vsel %vm40_vm0, %v39_v8, %v36_v7  ;;  %v43_v10 = vld [vmem:[#allocation3 + $0x1] ss:$8 sm:$0xf]  }
   0xe   :  { %v47_v12 = vsel %vm46_vm2, %v45_v6, %v43_v10  ;;  %p159_p4 = pnand %p158_p3, %p152_p0 }
   0xf   :  { %v49_v13 = vsel %vm29_vm1, %v47_v12, %v41_v9 }
  0x10   :  { %50 = vrot.lane.b32.xlu0 %v49_v13, %s173_s17 }
  0x13   :  { %v66_v14 = vld [vmem:[#allocation2] sm:$0x1]  ;;  %v71_v15 = vld [vmem:[#allocation2 + $0x8] sm:$0x1]  ;;  %v77_v16 = vld [vmem:[#allocation2 + $0x10] sm:$0x1] }
  0x14   :  { %69 = vst [vmem:[#allocation0] sm:$0x1] %v66_v14  ;;  %75 = vst [vmem:[#allocation0 + $0x1] sm:$0x1] %v71_v15  ;;  %v84_v17 = vld [vmem:[#allocation2 + $0x18] sm:$0x1] }
  0x15   :  { %82 = vst [vmem:[#allocation0 + $0x2] sm:$0x1] %v77_v16  ;;  %89 = vst [vmem:[#allocation0 + $0x3] sm:$0x1] %v84_v17 }
  0x82   :  { %v51_v18 = vpop.permute.xlu0 %50  }
  0x83   :  { %54 = vst.msk [vmem:[#allocation2 + $0x40] ss:$-24 sm:$0x3] %vm29_vm1, %v51_v18   ;;  %56 = vst.msk [vmem:[#allocation2 + $0x20] ss:$8 sm:$0xc] %vm29_vm1, %v51_v18  }
  0x84   :  { %59 = vst.msk [vmem:[#allocation2 + $0x20] ss:$8 sm:$0xf] %vm57_vm3, %v51_v18   ;;  %61 = vst.msk [vmem:[#allocation2 + $0x3c] sm:$0x10] %vm57_vm3, %v51_v18  }
  0x8b   :  { %v119_v19 = vld [vmem:[#allocation2 + $0x40] sm:$0x1]  ;;  %v98_v21 = vld [vmem:[#allocation2 + $0x28] sm:$0x1]  ;;  %v105_v22 = vld [vmem:[#allocation2 + $0x30] sm:$0x1] }
  0x8c   :  { %v91_v20 = vld [vmem:[#allocation2 + $0x20] sm:$0x1]  ;;  %124 = vst [vmem:[#allocation0 + $0x8] sm:$0x1] %v119_v19  ;;  %103 = vst [vmem:[#allocation0 + $0x5] sm:$0x1] %v98_v21 }
  0x8d   :  { %96 = vst [vmem:[#allocation0 + $0x4] sm:$0x1] %v91_v20  ;;  %v112_v23 = vld [vmem:[#allocation2 + $0x38] sm:$0x1]  ;;  %110 = vst [vmem:[#allocation0 + $0x6] sm:$0x1] %v105_v22 }
  0x8e   :  { %117 = vst [vmem:[#allocation0 + $0x7] sm:$0x1] %v112_v23 }
  0x8f   :  { %162 = shalt.err (!%p159_p4)
}
  0x90   :  { %132 = dma.vmem_to_hbm [thread:$0]  %s130_s19, 144, %s208_s1, [#allocation1]  }
  0x91   :  { %171 = dma.done.wait [#allocation1], 144  }
  0x92   :  { %172 = vsyncadd [#allocation1], 4294967152 }
  0x93   :  { %134 = vsyncpa [#allocation1], 1 }

// kernel: eq.1
= control target key start
LH: loop header
LB: loop body
LE: loop exit
PB: predicated region body
PF: predicated region fallthrough
CT: control target
= control target key end

     0   :  { %vm28_vm0 = vcmask 523264   ;;  %vm39_vm1 = vcmask 1044484   ;;  %s62_s19 = smov 64   ;;  %vm48_vm2 = vcmask 1048064   ;;  %s100_s0 = inlined_call_operand.vmem [shape: s32[2,576], index: 0, kind: input, shape index: {}]   ;;  %s101_s1 = inlined_call_operand.vmem [shape: s32[1152], index: 1, kind: output, shape index: {}]  }
   0x1   :  { %v54_v0 = vld [vmem:[%s100_s0 + $0x8] sm:$0x3]  ;;  %v55_v1 = vld [vmem:[%s100_s0 + $0x6] sm:$0x3]  ;;  %v56_v2 = vld [vmem:[%s100_s0 + $0x4] sm:$0x3] }
   0x2   :  { %9 = vst [vmem:[#allocation0 + $0x20] sm:$0x3] %v54_v0  ;;  %14 = vst [vmem:[#allocation0 + $0x18] sm:$0x3] %v55_v1  ;;  %v57_v3 = vld [vmem:[%s100_s0 + $0x2] sm:$0x3] }
   0x3   :  { %19 = vst [vmem:[#allocation0 + $0x10] sm:$0x3] %v56_v2  ;;  %v24_v4 = vld [vmem:[%s100_s0] sm:$0x3]  ;;  %23 = vst [vmem:[#allocation0 + $0x8] sm:$0x3] %v57_v3 }
   0x4   :  { %25 = vst [vmem:[#allocation0] sm:$0x3] %v24_v4 }
   0x9   :  { %v38_v5 = vld [vmem:[#allocation0 + $0x1d] sm:$0x10]   ;;  %v27_v6 = vld [vmem:[#allocation0 + $0x20] sm:$0x1]  }
   0xa   :  { %58 = vst.msk [vmem:[%s101_s1 + $0x4] sm:$0x1] %vm28_vm0, %v27_v6  }
   0xb   :  { %v31_v7 = vld [vmem:[#allocation0] ss:$8 sm:$0xf]   ;;  %v34_v8 = vld [vmem:[#allocation0 + $0x1] ss:$8 sm:$0xf]  }
   0xc   :  { %32 = vst [vmem:[%s101_s1] sm:$0xf] %v31_v7   ;;  %v36_v9 = vld [vmem:[#allocation0 + $0x1] ss:$8 sm:$0xf]  }
   0xd   :  { %v40_v10 = vsel %vm39_vm1, %v38_v5, %v36_v9 }
   0xe   :  { %v42_v11 = vsel %vm28_vm0, %v40_v10, %v34_v8 }
   0xf   :  { %43 = vrot.lane.b32.xlu0 %v42_v11, %s62_s19 }
  0x81   :  { %v44_v12 = vpop.permute.xlu0 %43  }
  0x82   :  { %59 = vst.msk [vmem:[%s101_s1 + $0x5] sm:$0xf] %vm28_vm0, %v44_v12  }
  0x83   :  { %60 = vst.msk [vmem:[%s101_s1 + $0x4] sm:$0x1f] %vm48_vm2, %v44_v12  }

// kernel: vector_quantizer_forward.1
= control target key start
LH: loop header
LB: loop body
LE: loop exit
PB: predicated region body
PF: predicated region fallthrough
CT: control target
= control target key end

     0   :  { %s3194_s24 = smov 0   ;;  %s3196_s25 = smov 0   ;;  %s5572_s0 = inlined_call_operand.vmem [shape: f32[2,32,640], index: 0, kind: input, shape index: {}]   ;;  %s5573_s1 = inlined_call_operand.vmem [shape: f32[128,32], index: 1, kind: input, shape index: {}]   ;;  %s5574_s2 = inlined_call_operand.vmem [shape: f32[32,128], index: 2, kind: input, shape index: {}]   ;;  %s5575_s3 = inlined_call_operand.vmem [shape: f32[128,1], index: 3, kind: input, shape index: {}]   ;;  %s5576_s4 = inlined_call_operand.vmem [shape: f32[2,32,640], index: 4, kind: output, shape index: {0}]   ;;  %s5577_s5 = inlined_call_operand.vmem [shape: s32[2,1,640], index: 5, kind: output, shape index: {1}]   ;;  %s5578_s6 = inlined_call_operand.vmem [shape: f32[2,128,1], index: 6, kind: output, shape index: {2}]   ;;  %s5579_s7 = inlined_call_operand.vmem [shape: f32[2,8,1], index: 7, kind: output, shape index: {3}]  }
   0x1   :  { %s3198_s26 = smov 0  }
   0x2 LB: > { %s30_s27 = sadd.s32 1, %s3144_s25  ;;  %p2744_p0 = scmp.ge.s32.totalorder %s3148_s26, 1  ;;  %s3148_s26 = sphi %s3198_s26, %s18_s26   ;;  %s3144_s25 = sphi %s3196_s25, %s5823_s25   ;;  %s3140_s24 = sphi %s3194_s24, %s5822_s24  }
   0x3   : > { %p32_p1 = scmp.ge.s32.totalorder %s30_s27, 2  ;;  %p271_p2 = scmp.lt.s32.totalorder %s3148_s26, 3 }
   0x5   : > { %s5825_s27 = smov (%p32_p1, %s30_s27), 0  ;;  %p272_p3 = pnand %p2744_p0, %p271_p2 }
   0x7   : > { %275 = sbr.rel (%p272_p3) target bundleno = 913 (0x391), region = 36 }
   0xc   : > { %p331_p4 = scmp.lt.s32.totalorder %s3140_s24, 1  ;;  %v5580_v0 = vmov 0.0   ;;  %v3151_v1 = vmov 0   ;;  %v412_v2 = vld [vmem:[%s5575_s3] sm:$0xff]  ;;  %v414_v3 = vld [vmem:[%s5575_s3 + $0x10] sm:$0xff]  ;;  %vm428_vm0 = vcmask 261120  }
   0xd   : > { %541 = vmatprep.mubr.f32.mxu0 %v5580_v0  ;;  %702 = vmatprep.mubr.f32.mxu1 %v5580_v0  ;;  %v3249_v20 = vld [vmem:[%s5573_s1] sm:$0xff]  ;;  %v413_v22 = vld [vmem:[%s5575_s3 + $0x8] sm:$0xff]  ;;  %v415_v23 = vld [vmem:[%s5575_s3 + $0x18] sm:$0xff] }
   0xe   : > { %s5827_s24 = smov (!%p331_p4, %s3140_s24), 1  ;;  %3104 = vset.pattern.permute.xlu0 %v3151_v1  ;;  %3105 = vset.pattern.permute.xlu1 %v3151_v1  ;;  %v3267_v24 = vld [vmem:[%s5573_s1 + $0x8] sm:$0xff]  ;;  %v416_v26 = vld [vmem:[%s5575_s3 + $0x20] sm:$0xff]  ;;  %v3285_v28 = vld [vmem:[%s5573_s1 + $0x10] sm:$0xff] }
   0xf   : > { %s3072_s28 = smul.u32 160, %s5827_s24  ;;  %1026 = vperm.xlu0 %3104, %v412_v2   ;;  %1036 = vperm.xlu1 %3105, %v414_v3   ;;  %v417_v27 = vld [vmem:[%s5575_s3 + $0x28] sm:$0xff]  ;;  %v418_v30 = vld [vmem:[%s5575_s3 + $0x30] sm:$0xff]  ;;  %v419_v31 = vld [vmem:[%s5575_s3 + $0x38] sm:$0xff]  ;;  %s2961_s17 = sshll.u32 %s5827_s24, 7 }
  0x10   : > { %v3303_v32 = vld [vmem:[%s5573_s1 + $0x18] sm:$0xff]  ;;  %v420_v34 = vld [vmem:[%s5575_s3 + $0x40] sm:$0xff]  ;;  %v421_v35 = vld [vmem:[%s5575_s3 + $0x48] sm:$0xff]  ;;  %s3073_s13 = smul.u32 5, %s5827_s24  ;;  %s5433_s20 = scalar_lea.vmem %s5578_s6, %s2961_s17 }
  0x11   : > { %s3225_s10 = scalar_lea.vmem %s5572_s0, %s3072_s28  ;;  %v3321_v36 = vld [vmem:[%s5573_s1 + $0x20] sm:$0xff]  ;;  %v422_v37 = vld [vmem:[%s5575_s3 + $0x50] sm:$0xff]  ;;  %v423_v38 = vld [vmem:[%s5575_s3 + $0x58] sm:$0xff]  ;;  %s5454_s23 = scalar_lea.vmem %s5576_s4, %s3072_s28 }
  0x12   : > { %v388_v4 = vld [vmem:[%s3225_s10 + $0x80] sm:$0xff]  ;;  %v390_v5 = vld [vmem:[%s3225_s10 + $0x90] sm:$0xff]  ;;  %v387_v6 = vld [vmem:[%s3225_s10 + $0x78] sm:$0xff]  ;;  %s357_s16 = scalar_lea.vmem %s5577_s5, %s3073_s13  ;;  %s2749_s28 = sshll.u32 %s5827_s24, 3 }
  0x13   : > { %501 = vmatprep.subr.mxu0 %v388_v4  ;;  %662 = vmatprep.subr.mxu1 %v390_v5  ;;  %v389_v7 = vld [vmem:[%s3225_s10 + $0x88] sm:$0xff]  ;;  %v383_v8 = vld [vmem:[%s3225_s10 + $0x58] sm:$0xff]  ;;  %v382_v10 = vld [vmem:[%s3225_s10 + $0x50] sm:$0xff]  ;;  %s370_s30 = scalar_lea.vmem %s5579_s7, %s2749_s28 }
  0x14   : > { %v385_v9 = vld [vmem:[%s3225_s10 + $0x68] sm:$0xff]  ;;  %502 = vmatpush1.msra.mxu0 %v387_v6  ;;  %663 = vmatpush1.msra.mxu1 %v389_v7  ;;  %v384_v11 = vld [vmem:[%s3225_s10 + $0x60] sm:$0xff]  ;;  %v378_v12 = vld [vmem:[%s3225_s10 + $0x30] sm:$0xff] }
  0x15   : > { %503 = vmatprep.subr.mxu0 %v383_v8  ;;  %664 = vmatprep.subr.mxu1 %v385_v9  ;;  %v380_v13 = vld [vmem:[%s3225_s10 + $0x40] sm:$0xff]  ;;  %v377_v14 = vld [vmem:[%s3225_s10 + $0x28] sm:$0xff]  ;;  %v379_v15 = vld [vmem:[%s3225_s10 + $0x38] sm:$0xff] }
  0x16   : > { %504 = vmatpush1.msra.mxu0 %v382_v10  ;;  %665 = vmatpush1.msra.mxu1 %v384_v11  ;;  %v373_v16 = vld [vmem:[%s3225_s10 + $0x8] sm:$0xff]  ;;  %v375_v17 = vld [vmem:[%s3225_s10 + $0x18] sm:$0xff]  ;;  %v372_v18 = vld [vmem:[%s3225_s10] sm:$0xff] }
  0x17   : > { %505 = vmatprep.subr.mxu0 %v378_v12  ;;  %666 = vmatprep.subr.mxu1 %v380_v13  ;;  %v374_v19 = vld [vmem:[%s3225_s10 + $0x10] sm:$0xff]  ;;  %v391_v21 = vld [vmem:[%s3225_s10 + $0x98] sm:$0xff]  ;;  %v381_v29 = vld [vmem:[%s3225_s10 + $0x48] sm:$0xff] }
  0x18   : > { %506 = vmatpush1.msra.mxu0 %v377_v14  ;;  %667 = vmatpush1.msra.mxu1 %v379_v15  ;;  %v386_v25 = vld [vmem:[%s3225_s10 + $0x70] sm:$0xff]  ;;  %v376_v33 = vld [vmem:[%s3225_s10 + $0x20] sm:$0xff]  ;;  %v3338_v39 = vld [vmem:[%s5573_s1 + $0x28] sm:$0xff] }
  0x19   : > { %507 = vmatprep.subr.mxu0 %v373_v16  ;;  %668 = vmatprep.subr.mxu1 %v375_v17  ;;  %v424_v40 = vld [vmem:[%s5575_s3 + $0x60] sm:$0xff]  ;;  %v425_v41 = vld [vmem:[%s5575_s3 + $0x68] sm:$0xff]  ;;  %v398_v42 = vld [vmem:[%s5573_s1 + $0x30] sm:$0xff] }
  0x1a   : > { %508 = vmatpush1.msra.mxu0 %v372_v18  ;;  %669 = vmatpush1.msra.mxu1 %v374_v19  ;;  %v426_v43 = vld [vmem:[%s5575_s3 + $0x70] sm:$0xff]  ;;  %v427_v44 = vld [vmem:[%s5575_s3 + $0x78] sm:$0xff]  ;;  %v400_v46 = vld [vmem:[%s5573_s1 + $0x40] sm:$0xff] }
  0x1b   : > { %2750 = vmatmul.mubr.msk.f32.vlgmr.msra.gmra.mxu0 %vm428_vm0, %v3249_v20  ;;  %2766 = vmatmul.mubr.msk.f32.vlgmr.msra.gmra.mxu1 %vm428_vm0, %v3249_v20  ;;  %v399_v45 = vld [vmem:[%s5573_s1 + $0x38] sm:$0xff]  ;;  %v401_v47 = vld [vmem:[%s5573_s1 + $0x48] sm:$0xff]  ;;  %v402_v48 = vld [vmem:[%s5573_s1 + $0x50] sm:$0xff] }
  0x1c   : > { %547 = vmatprep.mubr.f32.mxu0 %v5580_v0  ;;  %708 = vmatprep.mubr.f32.mxu1 %v5580_v0  ;;  %v403_v49 = vld [vmem:[%s5573_s1 + $0x58] sm:$0xff]  ;;  %v404_v50 = vld [vmem:[%s5573_s1 + $0x60] sm:$0xff]  ;;  %v405_v51 = vld [vmem:[%s5573_s1 + $0x68] sm:$0xff] }
  0x1d   : > { %3002 = vmatprep.subr.mxu0 %v391_v21  ;;  %1031 = vperm.xlu0 %3104, %v413_v22   ;;  %v406_v52 = vld [vmem:[%s5573_s1 + $0x70] sm:$0xff]  ;;  %v407_v53 = vld [vmem:[%s5573_s1 + $0x78] sm:$0xff] }
  0x1e   : > { %3003 = vmatpush3.msra.mxu0 %v391_v21  ;;  %1041 = vperm.xlu1 %3105, %v415_v23  }
  0x1f   : > { %2751 = vmatmul.mubr.msk.f32.gmra.mxu0 %vm428_vm0, %v3267_v24  ;;  %2767 = vmatmul.mubr.msk.f32.gmra.mxu1 %vm428_vm0, %v3267_v24 }
  0x20   : > { %553 = vmatprep.mubr.f32.mxu0 %v5580_v0  ;;  %714 = vmatprep.mubr.f32.mxu1 %v5580_v0 }
  0x21   : > { %3004 = vmatprep.subr.mxu0 %v386_v25  ;;  %1046 = vperm.xlu0 %3104, %v416_v26  }
  0x22   : > { %3005 = vmatpush3.msra.mxu0 %v386_v25  ;;  %1051 = vperm.xlu1 %3105, %v417_v27  }
  0x23   : > { %2752 = vmatmul.mubr.msk.f32.gmra.mxu0 %vm428_vm0, %v3285_v28  ;;  %2768 = vmatmul.mubr.msk.f32.gmra.mxu1 %vm428_vm0, %v3285_v28 }
  0x24   : > { %559 = vmatprep.mubr.f32.mxu0 %v5580_v0  ;;  %720 = vmatprep.mubr.f32.mxu1 %v5580_v0 }
  0x25   : > { %3006 = vmatprep.subr.mxu0 %v381_v29  ;;  %1056 = vperm.xlu0 %3104, %v418_v30  }
  0x26   : > { %3007 = vmatpush3.msra.mxu0 %v381_v29  ;;  %1061 = vperm.xlu1 %3105, %v419_v31  }
  0x27   : > { %2753 = vmatmul.mubr.msk.f32.gmra.mxu0 %vm428_vm0, %v3303_v32  ;;  %2769 = vmatmul.mubr.msk.f32.gmra.mxu1 %vm428_vm0, %v3303_v32 }
  0x28   : > { %565 = vmatprep.mubr.f32.mxu0 %v5580_v0  ;;  %726 = vmatprep.mubr.f32.mxu1 %v5580_v0 }
  0x29   : > { %3008 = vmatprep.subr.mxu0 %v376_v33  ;;  %1066 = vperm.xlu0 %3104, %v420_v34  }
  0x2a   : > { %3009 = vmatpush3.msra.mxu0 %v376_v33  ;;  %1071 = vperm.xlu1 %3105, %v421_v35  }
  0x2b   : > { %2754 = vmatmul.mubr.msk.f32.gmra.mxu0 %vm428_vm0, %v3321_v36  ;;  %2770 = vmatmul.mubr.msk.f32.gmra.mxu1 %vm428_vm0, %v3321_v36 }
  0x2c   : > { %571 = vmatprep.mubr.f32.mxu0 %v5580_v0  ;;  %732 = vmatprep.mubr.f32.mxu1 %v5580_v0 }
  0x2d   : > { %1076 = vperm.xlu0 %3104, %v422_v37  }
  0x2e   : > { %1081 = vperm.xlu1 %3105, %v423_v38  }
  0x2f   : > { %2755 = vmatmul.mubr.msk.f32.gmra.mxu0 %vm428_vm0, %v3338_v39  ;;  %2771 = vmatmul.mubr.msk.f32.gmra.mxu1 %vm428_vm0, %v3338_v39 }
  0x30   : > { %577 = vmatprep.mubr.f32.mxu0 %v5580_v0  ;;  %738 = vmatprep.mubr.f32.mxu1 %v5580_v0 }
  0x31   : > { %1086 = vperm.xlu0 %3104, %v424_v40  }
  0x32   : > { %1091 = vperm.xlu1 %3105, %v425_v41  }
  0x33   : > { %2756 = vmatmul.mubr.msk.f32.gmra.mxu0 %vm428_vm0, %v398_v42  ;;  %2772 = vmatmul.mubr.msk.f32.gmra.mxu1 %vm428_vm0, %v398_v42 }
  0x34   : > { %583 = vmatprep.mubr.f32.mxu0 %v5580_v0  ;;  %744 = vmatprep.mubr.f32.mxu1 %v5580_v0 }
  0x35   : > { %1096 = vperm.xlu0 %3104, %v426_v43  }
  0x36   : > { %1101 = vperm.xlu1 %3105, %v427_v44  }
  0x37   : > { %2757 = vmatmul.mubr.msk.f32.gmra.mxu0 %vm428_vm0, %v399_v45  ;;  %2773 = vmatmul.mubr.msk.f32.gmra.mxu1 %vm428_vm0, %v399_v45 }
  0x38   : > { %589 = vmatprep.mubr.f32.mxu0 %v5580_v0  ;;  %750 = vmatprep.mubr.f32.mxu1 %v5580_v0 }
  0x3b   : > { %2758 = vmatmul.mubr.msk.f32.gmra.mxu0 %vm428_vm0, %v400_v46  ;;  %2774 = vmatmul.mubr.msk.f32.gmra.mxu1 %vm428_vm0, %v400_v46 }
  0x3c   : > { %595 = vmatprep.mubr.f32.mxu0 %v5580_v0  ;;  %756 = vmatprep.mubr.f32.mxu1 %v5580_v0 }
  0x3f   : > { %2759 = vmatmul.mubr.msk.f32.gmra.mxu0 %vm428_vm0, %v401_v47  ;;  %2775 = vmatmul.mubr.msk.f32.gmra.mxu1 %vm428_vm0, %v401_v47 }
  0x40   : > { %601 = vmatprep.mubr.f32.mxu0 %v5580_v0  ;;  %762 = vmatprep.mubr.f32.mxu1 %v5580_v0 }
  0x43   : > { %2760 = vmatmul.mubr.msk.f32.gmra.mxu0 %vm428_vm0, %v402_v48  ;;  %2776 = vmatmul.mubr.msk.f32.gmra.mxu1 %vm428_vm0, %v402_v48 }
  0x44   : > { %607 = vmatprep.mubr.f32.mxu0 %v5580_v0  ;;  %768 = vmatprep.mubr.f32.mxu1 %v5580_v0 }
  0x47   : > { %2761 = vmatmul.mubr.msk.f32.gmra.mxu0 %vm428_vm0, %v403_v49  ;;  %2777 = vmatmul.mubr.msk.f32.gmra.mxu1 %vm428_vm0, %v403_v49 }
  0x48   : > { %613 = vmatprep.mubr.f32.mxu0 %v5580_v0  ;;  %774 = vmatprep.mubr.f32.mxu1 %v5580_v0 }
  0x4b   : > { %2762 = vmatmul.mubr.msk.f32.gmra.mxu0 %vm428_vm0, %v404_v50  ;;  %2778 = vmatmul.mubr.msk.f32.gmra.mxu1 %vm428_vm0, %v404_v50 }
  0x4c   : > { %619 = vmatprep.mubr.f32.mxu0 %v5580_v0  ;;  %780 = vmatprep.mubr.f32.mxu1 %v5580_v0 }
  0x4f   : > { %2763 = vmatmul.mubr.msk.f32.gmra.mxu0 %vm428_vm0, %v405_v51  ;;  %2779 = vmatmul.mubr.msk.f32.gmra.mxu1 %vm428_vm0, %v405_v51 }
  0x50   : > { %625 = vmatprep.mubr.f32.mxu0 %v5580_v0  ;;  %786 = vmatprep.mubr.f32.mxu1 %v5580_v0 }
  0x53   : > { %2764 = vmatmul.mubr.msk.f32.gmra.mxu0 %vm428_vm0, %v406_v52  ;;  %2780 = vmatmul.mubr.msk.f32.gmra.mxu1 %vm428_vm0, %v406_v52 }
  0x54   : > { %631 = vmatprep.mubr.f32.mxu0 %v5580_v0  ;;  %792 = vmatprep.mubr.f32.mxu1 %v5580_v0 }
  0x57   : > { %2765 = vmatmul.mubr.msk.f32.gmra.mxu0 %vm428_vm0, %v407_v53  ;;  %2781 = vmatmul.mubr.msk.f32.gmra.mxu1 %vm428_vm0, %v407_v53 }
  0x58   : > { %3010 = vmatprep.mubr.msk.f32.mxu0 %vm428_vm0, %v3249_v20  ;;  %1965 = vmatprep.mubr.f32.mxu1 %v5580_v0 }
  0x5b   : > { %3011 = vmatmul.mubr.msk.f32.vlgmr.msra.gmra.mxu0 %vm428_vm0, %v3267_v24 }
  0x5c   : > { %3013 = vmatprep.mubr.msk.f32.mxu0 %vm428_vm0, %v3285_v28 }
  0x5f   : > { %3014 = vmatmul.mubr.msk.f32.gmra.mxu0 %vm428_vm0, %v3303_v32 }
  0x60   : > { %3016 = vmatprep.mubr.msk.f32.mxu0 %vm428_vm0, %v3321_v36 }
  0x63   : > { %3017 = vmatmul.mubr.msk.f32.gmra.mxu0 %vm428_vm0, %v3338_v39 }
  0x64   : > { %3019 = vmatprep.mubr.msk.f32.mxu0 %vm428_vm0, %v398_v42 }
  0x67   : > { %3020 = vmatmul.mubr.msk.f32.gmra.mxu0 %vm428_vm0, %v399_v45 }
  0x68   : > { %3022 = vmatprep.mubr.msk.f32.mxu0 %vm428_vm0, %v400_v46 }
  0x6b   : > { %3023 = vmatmul.mubr.msk.f32.gmra.mxu0 %vm428_vm0, %v401_v47 }
  0x6c   : > { %3025 = vmatprep.mubr.msk.f32.mxu0 %vm428_vm0, %v402_v48 }
  0x6f   : > { %3026 = vmatmul.mubr.msk.f32.gmra.mxu0 %vm428_vm0, %v403_v49 }
  0x70   : > { %3028 = vmatprep.mubr.msk.f32.mxu0 %vm428_vm0, %v404_v50 }
  0x73   : > { %3029 = vmatmul.mubr.msk.f32.gmra.mxu0 %vm428_vm0, %v405_v51 }
  0x74   : > { %3031 = vmatprep.mubr.msk.f32.mxu0 %vm428_vm0, %v406_v52 }
  0x77   : > { %3032 = vmatmul.mubr.msk.f32.gmra.mxu0 %vm428_vm0, %v407_v53 }
  0x78   : > { %2054 = vmatprep.mubr.f32.mxu0 %v5580_v0 }
  0x8a   : > { %v3450_v62 = vpop.permute.xlu0 %1026  ;;  %v3454_v13 = vpop.permute.xlu1 %1036 }
  0x98   : > { %v3452_v9 = vpop.permute.xlu0 %1031 }
  0x99   : > { %v3478_v32 = vpop.permute.xlu1 %1041 }
  0x9c   : > { %v3488_v48 = vpop.permute.xlu0 %1046 }
  0xdb   : > { %v543_v54 = vpop.f32.mrf.mxu0  ;;  %v704_v55 = vpop.f32.mrf.mxu1 }
  0xdc   : > { %v946_v4 = vmul.f32 2.0, %v704_v55  ;;  %v944_v34 = vmul.f32 2.0, %v543_v54 }
  0xdd   : > { %v545_v56 = vpop.f32.mrf.mxu0  ;;  %v706_v57 = vpop.f32.mrf.mxu1 }
  0xde   : > { %v947_v8 = vmul.f32 2.0, %v706_v57  ;;  %v3457_v15 = vsub.f32 %v3450_v62, %v946_v4  ;;  %v945_v41 = vmul.f32 2.0, %v545_v56  ;;  %v3497_v52 = vsub.f32 %v3450_v62, %v944_v34 }
  0xdf   : > { %v549_v58 = vpop.f32.mrf.mxu0  ;;  %v710_v59 = vpop.f32.mrf.mxu1 }
  0xe0   : > { %v951_v5 = vmul.f32 2.0, %v710_v59  ;;  %v3463_v19 = vsub.f32 %v3450_v62, %v947_v8  ;;  %v949_v27 = vmul.f32 2.0, %v549_v58 }
  0xe1   : > { %v551_v60 = vpop.f32.mrf.mxu0  ;;  %v712_v61 = vpop.f32.mrf.mxu1 }
  0xe2   : > { %v952_v10 = vmul.f32 2.0, %v712_v61  ;;  %v3460_v16 = vsub.f32 %v3452_v9, %v951_v5  ;;  %5689 = vst [vmem:[#allocation2_spill] sm:$0xff] %v3463_v19  ;;  %v950_v35 = vmul.f32 2.0, %v551_v60  ;;  %v3485_v43 = vsub.f32 %v3452_v9, %v949_v27 }
  0xe3   : > { %v555_v63 = vpop.f32.mrf.mxu0  ;;  %v716_v1 = vpop.f32.mrf.mxu1  ;;  %v3504_v60 = vsub.f32 %v3450_v62, %v945_v41 }
  0xe4   : > { %v956_v14 = vmul.f32 2.0, %v716_v1  ;;  %v3466_v20 = vsub.f32 %v3452_v9, %v952_v10  ;;  %v1226_v25 = vmin.f32 %v3457_v15, %v3460_v16  ;;  %v954_v42 = vmul.f32 2.0, %v555_v63 }
  0xe5   : > { %v557_v2 = vpop.f32.mrf.mxu0  ;;  %v718_v3 = vpop.f32.mrf.mxu1  ;;  %v3494_v51 = vsub.f32 %v3452_v9, %v950_v35  ;;  %5694 = vst [vmem:[#allocation7_spill] sm:$0xff] %v3504_v60  ;;  %v1184_v63 = vmin.f32 %v3497_v52, %v3485_v43 }
  0xe6   : > { %5690 = vst [vmem:[#allocation3_spill] sm:$0xff] %v3466_v20  ;;  %v957_v21 = vmul.f32 2.0, %v718_v3  ;;  %v3469_v24 = vsub.f32 %v3454_v13, %v956_v14  ;;  %v1247_v30 = vmin.f32 %v3463_v19, %v3466_v20  ;;  %v955_v46 = vmul.f32 2.0, %v557_v2  ;;  %v3537_v35 = vpop.permute.xlu0 %1056 }
  0xe7   : > { %v561_v6 = vpop.f32.mrf.mxu0  ;;  %v722_v7 = vpop.f32.mrf.mxu1  ;;  %5693 = vst [vmem:[#allocation6_spill] sm:$0xff] %v3494_v51  ;;  %v3507_v61 = vsub.f32 %v3454_v13, %v954_v42  ;;  %v1205_v10 = vmin.f32 %v3504_v60, %v3494_v51  ;;  %5698 = vst [vmem:[#allocation11_spill] sm:$0xff] %v3537_v35 }
  0xe8   : > { %v961_v26 = vmul.f32 2.0, %v722_v7  ;;  %v3476_v31 = vsub.f32 %v3454_v13, %v957_v21  ;;  %v1227_v38 = vmin.f32 %v1226_v25, %v3469_v24  ;;  %v959_v53 = vmul.f32 2.0, %v561_v6  ;;  %v3515_v6 = vpop.permute.xlu1 %1051 }
  0xe9   : > { %v563_v11 = vpop.f32.mrf.mxu0  ;;  %v724_v12 = vpop.f32.mrf.mxu1  ;;  %v3512_v4 = vsub.f32 %v3454_v13, %v955_v46  ;;  %v1185_v27 = vmin.f32 %v1184_v63, %v3507_v61 }
  0xea   : > { %5691 = vst [vmem:[#allocation4_spill] sm:$0xff] %v3476_v31  ;;  %v962_v33 = vmul.f32 2.0, %v724_v12  ;;  %v3482_v39 = vsub.f32 %v3478_v32, %v961_v26  ;;  %v1248_v47 = vmin.f32 %v1247_v30, %v3476_v31  ;;  %v960_v57 = vmul.f32 2.0, %v563_v11 }
  0xeb   : > { %v567_v17 = vpop.f32.mrf.mxu0  ;;  %v728_v18 = vpop.f32.mrf.mxu1  ;;  %5695 = vst [vmem:[#allocation8_spill] sm:$0xff] %v3512_v4  ;;  %v3523_v11 = vsub.f32 %v3478_v32, %v959_v53  ;;  %v1206_v34 = vmin.f32 %v1205_v10, %v3512_v4 }
  0xec   : > { %v966_v40 = vmul.f32 2.0, %v728_v18  ;;  %v3491_v49 = vsub.f32 %v3478_v32, %v962_v33  ;;  %v1228_v56 = vmin.f32 %v1227_v38, %v3482_v39  ;;  %v964_v1 = vmul.f32 2.0, %v567_v17 }
  0xed   : > { %v569_v22 = vpop.f32.mrf.mxu0  ;;  %v730_v23 = vpop.f32.mrf.mxu1  ;;  %v3526_v21 = vsub.f32 %v3478_v32, %v960_v57  ;;  %v1186_v41 = vmin.f32 %v1185_v27, %v3523_v11 }
  0xee   : > { %5692 = vst [vmem:[#allocation5_spill] sm:$0xff] %v3491_v49  ;;  %v967_v50 = vmul.f32 2.0, %v730_v23  ;;  %v3501_v58 = vsub.f32 %v3488_v48, %v966_v40  ;;  %v1249_v5 = vmin.f32 %v1248_v47, %v3491_v49  ;;  %v965_v12 = vmul.f32 2.0, %v569_v22 }
  0xef   : > { %v573_v28 = vpop.f32.mrf.mxu0  ;;  %v734_v29 = vpop.f32.mrf.mxu1  ;;  %5697 = vst [vmem:[#allocation10_spill] sm:$0xff] %v3526_v21  ;;  %v1207_v47 = vmin.f32 %v1206_v34, %v3526_v21 }
  0xf0   : > { %v971_v59 = vmul.f32 2.0, %v734_v29  ;;  %v3518_v7 = vsub.f32 %v3488_v48, %v967_v50  ;;  %v969_v14 = vmul.f32 2.0, %v573_v28  ;;  %v1229_v23 = vmin.f32 %v1228_v56, %v3501_v58 }
  0xf1   : > { %v575_v36 = vpop.f32.mrf.mxu0  ;;  %v736_v37 = vpop.f32.mrf.mxu1  ;;  %v3534_v29 = vsub.f32 %v3488_v48, %v964_v1  ;;  %v3545_v42 = vsub.f32 %v3488_v48, %v965_v12 }
  0xf2   : > { %5696 = vst [vmem:[#allocation9_spill] sm:$0xff] %v3518_v7  ;;  %v972_v8 = vmul.f32 2.0, %v736_v37  ;;  %v3530_v25 = vsub.f32 %v3515_v6, %v971_v59  ;;  %v970_v30 = vmul.f32 2.0, %v575_v36  ;;  %v1250_v37 = vmin.f32 %v1249_v5, %v3518_v7  ;;  %v3562_v5 = vpop.permute.xlu1 %1061 }
  0xf3   : > { %v579_v44 = vpop.f32.mrf.mxu0  ;;  %v740_v45 = vpop.f32.mrf.mxu1  ;;  %5700 = vst [vmem:[#allocation13_spill] sm:$0xff] %v3545_v42  ;;  %v3548_v36 = vsub.f32 %v3515_v6, %v969_v14  ;;  %5702 = vst [vmem:[#allocation15_spill] sm:$0xff] %v3562_v5  ;;  %v1208_v14 = vmin.f32 %v1207_v47, %v3545_v42 }
  0xf4   : > { %v976_v26 = vmul.f32 2.0, %v740_v45  ;;  %v974_v33 = vmul.f32 2.0, %v579_v44  ;;  %v3541_v38 = vsub.f32 %v3515_v6, %v972_v8  ;;  %v1230_v50 = vmin.f32 %v1229_v23, %v3530_v25 }
  0xf5   : > { %v581_v54 = vpop.f32.mrf.mxu0  ;;  %v742_v55 = vpop.f32.mrf.mxu1  ;;  %v3557_v57 = vsub.f32 %v3515_v6, %v970_v30 }
  0xf6   : > { %5699 = vst [vmem:[#allocation12_spill] sm:$0xff] %v3541_v38  ;;  %v977_v40 = vmul.f32 2.0, %v742_v55  ;;  %v975_v44 = vmul.f32 2.0, %v581_v54  ;;  %v3553_v53 = vsub.f32 %v3537_v35, %v976_v26  ;;  %v1187_v55 = vmin.f32 %v1186_v41, %v3534_v29 }
  0xf7   : > { %v585_v2 = vpop.f32.mrf.mxu0  ;;  %v746_v3 = vpop.f32.mrf.mxu1  ;;  %5701 = vst [vmem:[#allocation14_spill] sm:$0xff] %v3557_v57  ;;  %v3560_v59 = vsub.f32 %v3537_v35, %v974_v33  ;;  %v1251_v8 = vmin.f32 %v1250_v37, %v3541_v38 }
  0xf8   : > { %v981_v56 = vmul.f32 2.0, %v746_v3  ;;  %v979_v63 = vmul.f32 2.0, %v585_v2  ;;  %v3566_v10 = vsub.f32 %v3537_v35, %v977_v40  ;;  %v1188_v23 = vmin.f32 %v1187_v55, %v3548_v36  ;;  %v3573_v33 = vpop.permute.xlu0 %1066  ;;  %v3595_v38 = vpop.permute.xlu1 %1071 }
  0xf9   : > { %v587_v17 = vpop.f32.mrf.mxu0  ;;  %v748_v18 = vpop.f32.mrf.mxu1  ;;  %v3571_v26 = vsub.f32 %v3537_v35, %v975_v44  ;;  %5705 = vst [vmem:[#allocation18_spill] sm:$0xff] %v3573_v33  ;;  %v1231_v34 = vmin.f32 %v1230_v50, %v3553_v53  ;;  %5708 = vst [vmem:[#allocation21_spill] sm:$0xff] %v3595_v38 }
  0xfa   : > { %5703 = vst [vmem:[#allocation16_spill] sm:$0xff] %v3566_v10  ;;  %v980_v12 = vmul.f32 2.0, %v587_v17  ;;  %v982_v3 = vmul.f32 2.0, %v748_v18  ;;  %v3577_v37 = vsub.f32 %v3562_v5, %v981_v56  ;;  %v1209_v18 = vmin.f32 %v1208_v14, %v3557_v57 }
  0xfb   : > { %v591_v22 = vpop.f32.mrf.mxu0  ;;  %v752_v28 = vpop.f32.mrf.mxu1  ;;  %5704 = vst [vmem:[#allocation17_spill] sm:$0xff] %v3571_v26  ;;  %v1189_v41 = vmin.f32 %v1188_v23, %v3560_v59  ;;  %v3582_v47 = vsub.f32 %v3562_v5, %v979_v63  ;;  %v1252_v55 = vmin.f32 %v1251_v8, %v3566_v10 }
  0xfc   : > { %v984_v27 = vmul.f32 2.0, %v591_v22  ;;  %v986_v40 = vmul.f32 2.0, %v752_v28  ;;  %v3586_v0 = vsub.f32 %v3562_v5, %v980_v12  ;;  %v3589_v50 = vsub.f32 %v3562_v5, %v982_v3 }
  0xfd   : > { %v593_v45 = vpop.f32.mrf.mxu0  ;;  %v754_v46 = vpop.f32.mrf.mxu1  ;;  %v1210_v28 = vmin.f32 %v1209_v18, %v3571_v26  ;;  %v1232_v8 = vmin.f32 %v1231_v34, %v3577_v37  ;;  %v1190_v18 = vmin.f32 %v1189_v41, %v3582_v47 }
  0xfe   : > { %v985_v17 = vmul.f32 2.0, %v593_v45  ;;  %5706 = vst [vmem:[#allocation19_spill] sm:$0xff] %v3586_v0  ;;  %5707 = vst [vmem:[#allocation20_spill] sm:$0xff] %v3589_v50  ;;  %v987_v56 = vmul.f32 2.0, %v754_v46  ;;  %v3593_v45 = vsub.f32 %v3573_v33, %v984_v27  ;;  %v3599_v12 = vsub.f32 %v3573_v33, %v986_v40 }
  0xff   : > { %v597_v54 = vpop.f32.mrf.mxu0  ;;  %v758_v1 = vpop.f32.mrf.mxu1  ;;  %v1211_v49 = vmin.f32 %v1210_v28, %v3586_v0  ;;  %v1253_v31 = vmin.f32 %v1252_v55, %v3589_v50 }
 0x100   : > { %v989_v14 = vmul.f32 2.0, %v597_v54  ;;  %v991_v23 = vmul.f32 2.0, %v758_v1  ;;  %v3602_v3 = vsub.f32 %v3573_v33, %v985_v17  ;;  %v3605_v1 = vpop.permute.xlu0 %1076  ;;  %v3610_v34 = vsub.f32 %v3573_v33, %v987_v56  ;;  %v3630_v50 = vpop.permute.xlu1 %1081 }
 0x101   : > { %v599_v2 = vpop.f32.mrf.mxu0  ;;  %v760_v30 = vpop.f32.mrf.mxu1  ;;  %5710 = vst [vmem:[#allocation23_spill] sm:$0xff] %v3605_v1  ;;  %v1191_v17 = vmin.f32 %v1190_v18, %v3593_v45  ;;  %v1233_v19 = vmin.f32 %v1232_v8, %v3599_v12  ;;  %5714 = vst [vmem:[#allocation27_spill] sm:$0xff] %v3630_v50 }
 0x102   : > { %5709 = vst [vmem:[#allocation22_spill] sm:$0xff] %v3602_v3  ;;  %v990_v46 = vmul.f32 2.0, %v599_v2  ;;  %v992_v10 = vmul.f32 2.0, %v760_v30  ;;  %5711 = vst [vmem:[#allocation24_spill] sm:$0xff] %v3610_v34  ;;  %v3614_v2 = vsub.f32 %v3595_v38, %v989_v14  ;;  %v3617_v30 = vsub.f32 %v3595_v38, %v991_v23 }
 0x103   : > { %v603_v44 = vpop.f32.mrf.mxu0  ;;  %v764_v22 = vpop.f32.mrf.mxu1  ;;  %v1212_v28 = vmin.f32 %v1211_v49, %v3602_v3  ;;  %v1254_v8 = vmin.f32 %v1253_v31, %v3610_v34 }
 0x104   : > { %v994_v27 = vmul.f32 2.0, %v603_v44  ;;  %v996_v40 = vmul.f32 2.0, %v764_v22  ;;  %v3622_v55 = vsub.f32 %v3595_v38, %v990_v46  ;;  %v3625_v22 = vsub.f32 %v3595_v38, %v992_v10  ;;  %v3641_v0 = vpop.permute.xlu0 %1086 }
 0x105   : > { %v605_v63 = vpop.f32.mrf.mxu0  ;;  %v766_v35 = vpop.f32.mrf.mxu1  ;;  %v1234_v10 = vmin.f32 %v1233_v19, %v3617_v30  ;;  %5716 = vst [vmem:[#allocation29_spill] sm:$0xff] %v3641_v0 }
 0x106   : > { %v995_v41 = vmul.f32 2.0, %v605_v63  ;;  %5712 = vst [vmem:[#allocation25_spill] sm:$0xff] %v3622_v55  ;;  %v997_v56 = vmul.f32 2.0, %v766_v35  ;;  %5713 = vst [vmem:[#allocation26_spill] sm:$0xff] %v3625_v22  ;;  %v3628_v14 = vsub.f32 %v3605_v1, %v994_v27  ;;  %v3634_v49 = vsub.f32 %v3605_v1, %v996_v40 }
 0x107   : > { %v609_v7 = vpop.f32.mrf.mxu0  ;;  %v770_v54 = vpop.f32.mrf.mxu1  ;;  %v1192_v35 = vmin.f32 %v1191_v17, %v3614_v2  ;;  %v1213_v26 = vmin.f32 %v1212_v28, %v3622_v55 }
 0x108   : > { %v999_v18 = vmul.f32 2.0, %v609_v7  ;;  %v1001_v23 = vmul.f32 2.0, %v770_v54  ;;  %v3639_v27 = vsub.f32 %v3605_v1, %v995_v41  ;;  %v3645_v31 = vsub.f32 %v3605_v1, %v997_v56  ;;  %v3680_v55 = vpop.permute.xlu0 %1096 }
 0x109   : > { %v611_v44 = vpop.f32.mrf.mxu0  ;;  %v772_v20 = vpop.f32.mrf.mxu1  ;;  %v1193_v17 = vmin.f32 %v1192_v35, %v3628_v14  ;;  %v1235_v57 = vmin.f32 %v1234_v10, %v3634_v49  ;;  %5724 = vst [vmem:[#allocation37_spill] sm:$0xff] %v3680_v55 }
 0x10a   : > { %v1000_v46 = vmul.f32 2.0, %v611_v44  ;;  %v1002_v3 = vmul.f32 2.0, %v772_v20  ;;  %5715 = vst [vmem:[#allocation28_spill] sm:$0xff] %v3639_v27  ;;  %5717 = vst [vmem:[#allocation30_spill] sm:$0xff] %v3645_v31  ;;  %v1255_v20 = vmin.f32 %v1254_v8, %v3625_v22  ;;  %v3650_v19 = vsub.f32 %v3630_v50, %v999_v18  ;;  %v3666_v22 = vpop.permute.xlu1 %1091 }
 0x10b   : > { %v615_v33 = vpop.f32.mrf.mxu0  ;;  %v776_v63 = vpop.f32.mrf.mxu1  ;;  %v1214_v8 = vmin.f32 %v1213_v26, %v3639_v27  ;;  %5721 = vst [vmem:[#allocation34_spill] sm:$0xff] %v3666_v22 }
 0x10c   : > { %v1004_v7 = vmul.f32 2.0, %v615_v33  ;;  %v1006_v40 = vmul.f32 2.0, %v776_v63  ;;  %v3653_v33 = vsub.f32 %v3630_v50, %v1001_v23  ;;  %v3657_v28 = vsub.f32 %v3630_v50, %v1000_v46 }
 0x10d   : > { %v617_v54 = vpop.f32.mrf.mxu0  ;;  %v778_v38 = vpop.f32.mrf.mxu1  ;;  %v3660_v56 = vsub.f32 %v3630_v50, %v1002_v3  ;;  %v1256_v10 = vmin.f32 %v1255_v20, %v3645_v31  ;;  %v1194_v26 = vmin.f32 %v1193_v17, %v3650_v19 }
 0x10e   : > { %v1005_v44 = vmul.f32 2.0, %v617_v54  ;;  %5718 = vst [vmem:[#allocation31_spill] sm:$0xff] %v3653_v33  ;;  %5719 = vst [vmem:[#allocation32_spill] sm:$0xff] %v3657_v28  ;;  %v3664_v35 = vsub.f32 %v3641_v0, %v1004_v7  ;;  %v1007_v18 = vmul.f32 2.0, %v778_v38  ;;  %v3670_v46 = vsub.f32 %v3641_v0, %v1006_v40 }
 0x10f   : > { %v621_v41 = vpop.f32.mrf.mxu0  ;;  %v782_v34 = vpop.f32.mrf.mxu1  ;;  %5720 = vst [vmem:[#allocation33_spill] sm:$0xff] %v3660_v56  ;;  %v1236_v7 = vmin.f32 %v1235_v57, %v3653_v33  ;;  %v1215_v20 = vmin.f32 %v1214_v8, %v3657_v28  ;;  %v1257_v40 = vmin.f32 %v1256_v10, %v3660_v56 }
 0x110   : > { %v1009_v63 = vmul.f32 2.0, %v621_v41  ;;  %v1011_v54 = vmul.f32 2.0, %v782_v34  ;;  %5722 = vst [vmem:[#allocation35_spill] sm:$0xff] %v3670_v46  ;;  %v3673_v3 = vsub.f32 %v3641_v0, %v1005_v44  ;;  %v1195_v17 = vmin.f32 %v1194_v26, %v3664_v35  ;;  %v3706_v56 = vpop.permute.xlu1 %1101 }
 0x111   : > { %v623_v23 = vpop.f32.mrf.mxu0  ;;  %v784_v1 = vpop.f32.mrf.mxu1  ;;  %v3689_v57 = vsub.f32 %v3641_v0, %v1007_v18  ;;  %v1237_v21 = vmin.f32 %v1236_v7, %v3670_v46  ;;  %5730 = vst [vmem:[#allocation43_spill] sm:$0xff] %v3706_v56 }
 0x112   : > { %5723 = vst [vmem:[#allocation36_spill] sm:$0xff] %v3673_v3  ;;  %v1010_v41 = vmul.f32 2.0, %v623_v23  ;;  %v3678_v38 = vsub.f32 %v3666_v22, %v1009_v63  ;;  %v1012_v34 = vmul.f32 2.0, %v784_v1  ;;  %v3685_v44 = vsub.f32 %v3666_v22, %v1011_v54 }
 0x113   : > { %v627_v50 = vpop.f32.mrf.mxu0  ;;  %v788_v27 = vpop.f32.mrf.mxu1  ;;  %5726 = vst [vmem:[#allocation39_spill] sm:$0xff] %v3689_v57  ;;  %v1216_v8 = vmin.f32 %v1215_v20, %v3673_v3 }
 0x114   : > { %5725 = vst [vmem:[#allocation38_spill] sm:$0xff] %v3685_v44  ;;  %v1014_v23 = vmul.f32 2.0, %v627_v50  ;;  %v3692_v63 = vsub.f32 %v3666_v22, %v1010_v41  ;;  %v1016_v1 = vmul.f32 2.0, %v788_v27  ;;  %v1196_v50 = vmin.f32 %v1195_v17, %v3678_v38 }
 0x115   : > { %v629_v31 = vpop.f32.mrf.mxu0  ;;  %v790_v42 = vpop.f32.mrf.mxu1  ;;  %v3701_v26 = vsub.f32 %v3666_v22, %v1012_v34  ;;  %v1238_v7 = vmin.f32 %v1237_v21, %v3685_v44  ;;  %v1258_v17 = vmin.f32 %v1257_v40, %v3689_v57 }
 0x116   : > { %5727 = vst [vmem:[#allocation40_spill] sm:$0xff] %v3692_v63  ;;  %v3697_v10 = vsub.f32 %v3680_v55, %v1014_v23  ;;  %v1015_v54 = vmul.f32 2.0, %v629_v31  ;;  %v3704_v18 = vsub.f32 %v3680_v55, %v1016_v1  ;;  %v1017_v41 = vmul.f32 2.0, %v790_v42 }
 0x117   : > { %5728 = vst [vmem:[#allocation41_spill] sm:$0xff] %v3701_v26  ;;  %v633_v27 = vpop.f32.mrf.mxu0  ;;  %v794_v0 = vpop.f32.mrf.mxu1  ;;  %v1217_v34 = vmin.f32 %v1216_v8, %v3692_v63  ;;  %v1259_v40 = vmin.f32 %v1258_v17, %v3701_v26 }
 0x118   : > { %5729 = vst [vmem:[#allocation42_spill] sm:$0xff] %v3704_v18  ;;  %v3710_v20 = vsub.f32 %v3680_v55, %v1015_v54  ;;  %v1019_v23 = vmul.f32 2.0, %v633_v27  ;;  %v1021_v31 = vmul.f32 2.0, %v794_v0  ;;  %v1197_v22 = vmin.f32 %v1196_v50, %v3697_v10 }
 0x119   : > { %v3716_v1 = vsub.f32 %v3680_v55, %v1017_v41  ;;  %v635_v42 = vpop.f32.mrf.mxu0  ;;  %v796_v3 = vpop.f32.mrf.mxu1  ;;  %v1239_v28 = vmin.f32 %v1238_v7, %v3704_v18 }
 0x11a   : > { %5731 = vst [vmem:[#allocation44_spill] sm:$0xff] %v3710_v20  ;;  %v3720_v21 = vsub.f32 %v3706_v56, %v1019_v23  ;;  %v3723_v54 = vsub.f32 %v3706_v56, %v1021_v31  ;;  %v1020_v0 = vmul.f32 2.0, %v635_v42  ;;  %v1022_v8 = vmul.f32 2.0, %v796_v3 }
 0x11b   : > { %5732 = vst [vmem:[#allocation45_spill] sm:$0xff] %v3716_v1  ;;  %v3012_v57 = vpop.f32.mrf.mxu0  ;;  %v1218_v50 = vmin.f32 %v1217_v34, %v3710_v20  ;;  %v1260_v23 = vmin.f32 %v1259_v40, %v3716_v1 }
 0x11c   : > { %5733 = vst [vmem:[#allocation46_spill] sm:$0xff] %v3723_v54  ;;  %v1198_v41 = vmin.f32 %v1197_v22, %v3720_v21  ;;  %v1240_v55 = vmin.f32 %v1239_v28, %v3723_v54  ;;  %v3730_v7 = vsub.f32 %v3706_v56, %v1020_v0  ;;  %v3734_v31 = vsub.f32 %v3706_v56, %v1022_v8 }
 0x11d   : > { %v865_v42 = vpop.f32.mrf.mxu0  ;;  %v5736_v22 = vlaneseq  ;;  %v953_v60 = vmul.f32 2.0, %v3012_v57 }
 0x11e   : > { %5734 = vst [vmem:[#allocation47_spill] sm:$0xff] %v3730_v7  ;;  %5735 = vst [vmem:[#allocation48_spill] sm:$0xff] %v3734_v31  ;;  %v1199_v63 = vrot.slane %v1198_v41, 4  ;;  %v1241_v17 = vrot.slane %v1240_v55, 4  ;;  %v1219_v3 = vmin.f32 %v1218_v50, %v3730_v7  ;;  %v1261_v27 = vmin.f32 %v1260_v23, %v3734_v31 }
 0x11f   : > { %v3015_v34 = vpop.f32.mrf.mxu0  ;;  %v3739_v20 = vshrl.u32 %v5736_v22, 7  ;;  %v948_v51 = vmul.f32 2.0, %v865_v42 }
 0x120   : > { %v1200_v26 = vmin.f32 %v1198_v41, %v1199_v63  ;;  %v1242_v28 = vmin.f32 %v1240_v55, %v1241_v17  ;;  %v1220_v0 = vrot.slane %v1219_v3, 4  ;;  %v1262_v4 = vrot.slane %v1261_v27, 4 }
 0x121   : > { %v875_v40 = vpop.f32.mrf.mxu0  ;;  %v3742_v23 = vadd.s32 8, %v3739_v20  ;;  %v3745_v63 = vadd.s32 16, %v3739_v20  ;;  %v3748_v55 = vadd.s32 24, %v3739_v20  ;;  %v3751_v41 = vadd.s32 32, %v3739_v20 }
 0x122   : > { %v1201_v1 = vrot.slane %v1200_v26, 2  ;;  %v1243_v8 = vrot.slane %v1242_v28, 2  ;;  %v1221_v56 = vmin.f32 %v1219_v3, %v1220_v0  ;;  %v1263_v5 = vmin.f32 %v1261_v27, %v1262_v4 }
 0x123   : > { %v958_v54 = vmul.f32 2.0, %v875_v40  ;;  %v3018_v18 = vpop.f32.mrf.mxu0  ;;  %v3754_v17 = vsub.f32 %v3450_v62, %v948_v51  ;;  %v3757_v57 = vadd.s32 40, %v3739_v20  ;;  %v3760_v27 = vadd.s32 48, %v3739_v20 }
 0x124   : > { %v1202_v50 = vmin.f32 %v1200_v26, %v1201_v1  ;;  %v1244_v42 = vmin.f32 %v1242_v28, %v1243_v8  ;;  %v1222_v26 = vrot.slane %v1221_v56, 2  ;;  %v1264_v1 = vrot.slane %v1263_v5, 2 }
 0x125   : > { %v3763_v3 = vadd.s32 56, %v3739_v20  ;;  %v3766_v0 = vsub.f32 %v3452_v9, %v953_v60  ;;  %v3769_v28 = vsub.f32 %v3454_v13, %v958_v54  ;;  %v885_v62 = vpop.f32.mrf.mxu0  ;;  %v3774_v40 = vadd.s32 64, %v3739_v20 }
 0x126   : > { %v1203_v4 = vrot.slane %v1202_v50, 1  ;;  %v3777_v8 = vadd.s32 72, %v3739_v20  ;;  %v3780_v22 = vadd.s32 80, %v3739_v20  ;;  %v1245_v31 = vrot.slane %v1244_v42, 1 }
 0x127   : > { %5737 = vst [vmem:[#allocation49_spill] sm:$0xff] %v3766_v0  ;;  %5738 = vst [vmem:[#allocation50_spill] sm:$0xff] %v3769_v28  ;;  %v1268_v9 = vmin.f32 %v3754_v17, %v3766_v0  ;;  %v963_v60 = vmul.f32 2.0, %v3015_v34  ;;  %v973_v7 = vmul.f32 2.0, %v3018_v18  ;;  %v3785_v13 = vadd.s32 88, %v3739_v20  ;;  %v3021_v18 = vpop.f32.mrf.mxu0 }
 0x128   : > { %v3771_v51 = vmin.f32 %v1202_v50, %v1203_v4  ;;  %v3787_v54 = vmin.f32 %v1221_v56, %v1222_v26  ;;  %v3789_v50 = vmin.f32 %v1263_v5, %v1264_v1  ;;  %v968_v4 = vmul.f32 2.0, %v885_v62 }
 0x129   : > { %v3792_v44 = vadd.s32 96, %v3739_v20  ;;  %v3795_v46 = vadd.s32 104, %v3739_v20  ;;  %v3798_v33 = vadd.s32 112, %v3739_v20  ;;  %v3801_v34 = vmin.f32 %v1268_v9, %v3769_v28 }
 0x12a   : > { %v3804_v0 = vadd.s32 120, %v3739_v20  ;;  %vm1306_vm1 = vcmp.eq.f32.partialorder %v3497_v52, %v3771_v51  ;;  %vm1311_vm2 = vcmp.eq.f32.partialorder %v3485_v43, %v3771_v51  ;;  %v3810_v5 = vmin.f32 %v1244_v42, %v1245_v31 }
 0x12b   : > { %v3813_v56 = vsub.f32 %v3478_v32, %v963_v60  ;;  %v3816_v26 = vsub.f32 %v3515_v6, %v973_v7  ;;  %v1224_v1 = vrot.slane %v3787_v54, 1  ;;  %v1266_v62 = vrot.slane %v3789_v50, 1 }
 0x12c   : > { %v3821_v9 = vsub.f32 %v3488_v48, %v968_v4  ;;  %v3823_v28 = vmul.f32 2.0, %v3021_v18  ;;  %vm1316_vm3 = vcmp.eq.f32.partialorder %v3507_v61, %v3771_v51  ;;  %v1386_v43 = vsel %vm1306_vm1, %v3739_v20, 128 }
 0x12d   : > { %v1391_v32 = vsel %vm1311_vm2, %v3742_v23, 128  ;;  %v1270_v52 = vmin.f32 %v3801_v34, %v3813_v56  ;;  %vm1321_vm4 = vcmp.eq.f32.partialorder %v3523_v11, %v3771_v51  ;;  %vm1326_vm5 = vcmp.eq.f32.partialorder %v3534_v29, %v3771_v51  ;;  %v5748_v34 = vld [vmem:[#allocation8_spill] sm:$0xff] }
 0x12e   : > { %vm1331_vm6 = vcmp.eq.f32.partialorder %v3548_v36, %v3771_v51  ;;  %vm1336_vm7 = vcmp.eq.f32.partialorder %v3560_v59, %v3771_v51  ;;  %vm1341_vm8 = vcmp.eq.f32.partialorder %v3582_v47, %v3771_v51  ;;  %vm1346_vm9 = vcmp.eq.f32.partialorder %v3593_v45, %v3771_v51 }
 0x12f   : > { %vm1351_vm10 = vcmp.eq.f32.partialorder %v3614_v2, %v3771_v51  ;;  %vm1356_vm11 = vcmp.eq.f32.partialorder %v3628_v14, %v3771_v51  ;;  %vm1361_vm12 = vcmp.eq.f32.partialorder %v3650_v19, %v3771_v51  ;;  %vm1366_vm13 = vcmp.eq.f32.partialorder %v3664_v35, %v3771_v51 }
 0x130   : > { %vm1371_vm14 = vcmp.eq.f32.partialorder %v3678_v38, %v3771_v51  ;;  %vm1466_vm15 = vcmp.lt.s32.totalorder %v1386_v43, %v1391_v32  ;;  %vm1376_vm0 = vcmp.eq.f32.partialorder %v3697_v10, %v3771_v51  ;;  %vm1381_vm1 = vcmp.eq.f32.partialorder %v3720_v21, %v3771_v51  ;;  %v5739_v51 = vld [vmem:[#allocation31_spill] sm:$0xff] }
 0x131   : > { %v1396_v48 = vsel %vm1316_vm3, %v3745_v63, 128  ;;  %v1467_v6 = vsel %vm1466_vm15, %v1386_v43, %v1391_v32  ;;  %v1401_v7 = vsel %vm1321_vm4, %v3748_v55, 128  ;;  %v1406_v31 = vsel %vm1326_vm5, %v3751_v41, 128  ;;  %v5740_v43 = vld [vmem:[#allocation35_spill] sm:$0xff]  ;;  %v5741_v32 = vld [vmem:[#allocation38_spill] sm:$0xff] }
 0x132   : > { %v1411_v42 = vsel %vm1331_vm6, %v3757_v57, 128  ;;  %vm1468_vm2 = vcmp.lt.s32.totalorder %v1467_v6, %v1396_v48  ;;  %v1416_v61 = vsel %vm1336_vm7, %v3760_v27, 128  ;;  %v1421_v11 = vsel %vm1341_vm8, %v3763_v3, 128 }
 0x133   : > { %v1426_v29 = vsel %vm1346_vm9, %v3774_v40, 128  ;;  %v1469_v60 = vsel %vm1468_vm2, %v1467_v6, %v1396_v48  ;;  %v1431_v36 = vsel %vm1351_vm10, %v3777_v8, 128  ;;  %vm1308_vm4 = vcmp.eq.f32.partialorder %v3457_v15, %v3810_v5  ;;  %v5742_v6 = vld [vmem:[#allocation42_spill] sm:$0xff] }
 0x134   : > { %vm1470_vm3 = vcmp.lt.s32.totalorder %v1469_v60, %v1401_v7  ;;  %vm1313_vm5 = vcmp.eq.f32.partialorder %v3460_v16, %v3810_v5  ;;  %v1436_v59 = vsel %vm1356_vm11, %v3780_v22, 128  ;;  %v3901_v47 = vsel %vm1361_vm12, %v3785_v13, 128 }
 0x135   : > { %v3907_v45 = vsel %vm1366_vm13, %v3792_v44, 128  ;;  %v1471_v15 = vsel %vm1470_vm3, %v1469_v60, %v1401_v7  ;;  %v3913_v16 = vsel %vm1371_vm14, %v3795_v46, 128  ;;  %v3919_v2 = vsel %vm1376_vm0, %v3798_v33, 128 }
 0x136   : > { %v3925_v14 = vsel %vm1381_vm1, %v3804_v0, 128  ;;  %vm1472_vm6 = vcmp.lt.s32.totalorder %v1471_v15, %v1406_v31  ;;  %vm1318_vm7 = vcmp.eq.f32.partialorder %v3469_v24, %v3810_v5  ;;  %v1388_v35 = vsel %vm1308_vm4, %v3739_v20, 128 }
 0x137   : > { %v1473_v19 = vsel %vm1472_vm6, %v1471_v15, %v1406_v31  ;;  %v1393_v38 = vsel %vm1313_vm5, %v3742_v23, 128  ;;  %vm1323_vm9 = vcmp.eq.f32.partialorder %v3482_v39, %v3810_v5  ;;  %vm1328_vm10 = vcmp.eq.f32.partialorder %v3501_v58, %v3810_v5  ;;  %v5743_v31 = vld [vmem:[#allocation46_spill] sm:$0xff] }
 0x138   : > { %vm1474_vm8 = vcmp.lt.s32.totalorder %v1473_v19, %v1411_v42  ;;  %vm1333_vm11 = vcmp.eq.f32.partialorder %v3530_v25, %v3810_v5  ;;  %vm1338_vm12 = vcmp.eq.f32.partialorder %v3553_v53, %v3810_v5  ;;  %vm1343_vm13 = vcmp.eq.f32.partialorder %v3577_v37, %v3810_v5 }
 0x139   : > { %v1475_v10 = vsel %vm1474_vm8, %v1473_v19, %v1411_v42  ;;  %vm1348_vm14 = vcmp.eq.f32.partialorder %v3599_v12, %v3810_v5  ;;  %vm1353_vm0 = vcmp.eq.f32.partialorder %v3617_v30, %v3810_v5  ;;  %vm1358_vm1 = vcmp.eq.f32.partialorder %v3634_v49, %v3810_v5 }
 0x13a   : > { %vm1476_vm15 = vcmp.lt.s32.totalorder %v1475_v10, %v1416_v61  ;;  %vm1544_vm2 = vcmp.lt.s32.totalorder %v1388_v35, %v1393_v38  ;;  %vm1363_vm3 = vcmp.eq.f32.partialorder %v5739_v51, %v3810_v5  ;;  %v1398_v4 = vsel %vm1318_vm7, %v3745_v63, 128 }
 0x13b   : > { %v1477_v21 = vsel %vm1476_vm15, %v1475_v10, %v1416_v61  ;;  %v1545_v18 = vsel %vm1544_vm2, %v1388_v35, %v1393_v38  ;;  %vm1368_vm5 = vcmp.eq.f32.partialorder %v5740_v43, %v3810_v5  ;;  %vm1378_vm15 = vcmp.eq.f32.partialorder %v5742_v6, %v3810_v5 }
 0x13c   : > { %vm1478_vm4 = vcmp.lt.s32.totalorder %v1477_v21, %v1421_v11  ;;  %vm1546_vm8 = vcmp.lt.s32.totalorder %v1545_v18, %v1398_v4  ;;  %v1403_v7 = vsel %vm1323_vm9, %v3748_v55, 128  ;;  %vm1383_vm2 = vcmp.eq.f32.partialorder %v5743_v31, %v3810_v5  ;;  %v5753_v31 = vld [vmem:[#allocation19_spill] sm:$0xff] }
 0x13d   : > { %v1479_v48 = vsel %vm1478_vm4, %v1477_v21, %v1421_v11  ;;  %v1547_v24 = vsel %vm1546_vm8, %v1545_v18, %v1398_v4  ;;  %v1408_v42 = vsel %vm1328_vm10, %v3751_v41, 128  ;;  %v1413_v11 = vsel %vm1333_vm11, %v3757_v57, 128  ;;  %v5750_v18 = vld [vmem:[#allocation13_spill] sm:$0xff] }
 0x13e   : > { %vm1480_vm7 = vcmp.lt.s32.totalorder %v1479_v48, %v1426_v29  ;;  %vm1548_vm6 = vcmp.lt.s32.totalorder %v1547_v24, %v1403_v7  ;;  %v1418_v39 = vsel %vm1338_vm12, %v3760_v27, 128  ;;  %v1423_v58 = vsel %vm1343_vm13, %v3763_v3, 128 }
 0x13f   : > { %v1481_v61 = vsel %vm1480_vm7, %v1479_v48, %v1426_v29  ;;  %v1549_v60 = vsel %vm1548_vm6, %v1547_v24, %v1403_v7  ;;  %v1428_v29 = vsel %vm1348_vm14, %v3774_v40, 128  ;;  %v1433_v53 = vsel %vm1353_vm0, %v3777_v8, 128  ;;  %v4065_v7 = vpop.f32.mrf.mxu0 }
 0x140   : > { %vm1482_vm9 = vcmp.lt.s32.totalorder %v1481_v61, %v1431_v36  ;;  %vm1550_vm10 = vcmp.lt.s32.totalorder %v1549_v60, %v1408_v42  ;;  %v1438_v15 = vsel %vm1358_vm1, %v3780_v22, 128  ;;  %v1443_v37 = vsel %vm1363_vm3, %v3785_v13, 128 }
 0x141   : > { %v1483_v25 = vsel %vm1482_vm9, %v1481_v61, %v1431_v36  ;;  %v1551_v19 = vsel %vm1550_vm10, %v1549_v60, %v1408_v42  ;;  %v4000_v12 = vmin.f32 %v3787_v54, %v1224_v1  ;;  %v1448_v49 = vsel %vm1368_vm5, %v3792_v44, 128  ;;  %v5754_v42 = vld [vmem:[#allocation22_spill] sm:$0xff]  ;;  %v5755_v61 = vld [vmem:[#allocation25_spill] sm:$0xff] }
 0x142   : > { %vm1484_vm11 = vcmp.lt.s32.totalorder %v1483_v25, %v1436_v59  ;;  %vm1552_vm12 = vcmp.lt.s32.totalorder %v1551_v19, %v1413_v11  ;;  %vm5744_vm13 = vcmp.eq.f32.partialorder %v5741_v32, %v3810_v5  ;;  %v4017_v54 = vsel %vm1378_vm15, %v3798_v33, 128  ;;  %v5745_v5 = vld [vmem:[#allocation7_spill] sm:$0xff]  ;;  %v5752_v32 = vld [vmem:[#allocation17_spill] sm:$0xff] }
 0x143   : > { %v1485_v30 = vsel %vm1484_vm11, %v1483_v25, %v1436_v59  ;;  %v4010_v36 = vsel %vm5744_vm13, %v3795_v46, 128  ;;  %v1553_v35 = vsel %vm1552_vm12, %v1551_v19, %v1413_v11  ;;  %v4023_v1 = vsel %vm1383_vm2, %v3804_v0, 128  ;;  %v5756_v11 = vld [vmem:[#allocation28_spill] sm:$0xff] }
 0x144   : > { %vm1486_vm14 = vcmp.lt.s32.totalorder %v1485_v30, %v3901_v47  ;;  %vm1554_vm0 = vcmp.lt.s32.totalorder %v1553_v35, %v1418_v39  ;;  %v4029_v10 = vmin.f32 %v3789_v50, %v1266_v62  ;;  %v4035_v21 = vmin.f32 %v1270_v52, %v3821_v9  ;;  %v5747_v62 = vld [vmem:[#allocation6_spill] sm:$0xff] }
 0x145   : > { %v1487_v59 = vsel %vm1486_vm14, %v1485_v30, %v3901_v47  ;;  %v1555_v38 = vsel %vm1554_vm0, %v1553_v35, %v1418_v39  ;;  %vm1307_vm4 = vcmp.eq.f32.partialorder %v5745_v5, %v4000_v12  ;;  %v5746_v47 = vld [vmem:[#allocation15_spill] sm:$0xff]  ;;  %vm1312_vm5 = vcmp.eq.f32.partialorder %v5747_v62, %v4000_v12  ;;  %v5749_v52 = vld [vmem:[#allocation10_spill] sm:$0xff]  ;;  %v5758_v30 = vld [vmem:[#allocation36_spill] sm:$0xff] }
 0x146   : > { %vm1488_vm1 = vcmp.lt.s32.totalorder %v1487_v59, %v3907_v45  ;;  %vm1556_vm3 = vcmp.lt.s32.totalorder %v1555_v38, %v1423_v58  ;;  %v4042_v51 = vsub.f32 %v5746_v47, %v3823_v28  ;;  %vm1317_vm6 = vcmp.eq.f32.partialorder %v5748_v34, %v4000_v12  ;;  %v5760_v5 = vld [vmem:[#allocation44_spill] sm:$0xff]  ;;  %v5761_v34 = vld [vmem:[#allocation47_spill] sm:$0xff] }
 0x147   : > { %v1489_v4 = vsel %vm1488_vm1, %v1487_v59, %v3907_v45  ;;  %v1557_v50 = vsel %vm1556_vm3, %v1555_v38, %v1423_v58  ;;  %vm1322_vm7 = vcmp.eq.f32.partialorder %v5749_v52, %v4000_v12  ;;  %vm1327_vm2 = vcmp.eq.f32.partialorder %v5750_v18, %v4000_v12  ;;  %v5751_v45 = vld [vmem:[#allocation14_spill] sm:$0xff] }
 0x148   : > { %vm1490_vm8 = vcmp.lt.s32.totalorder %v1489_v4, %v3913_v16  ;;  %vm1558_vm15 = vcmp.lt.s32.totalorder %v1557_v50, %v1428_v29  ;;  %vm1332_vm9 = vcmp.eq.f32.partialorder %v5751_v45, %v4000_v12  ;;  %vm1337_vm10 = vcmp.eq.f32.partialorder %v5752_v32, %v4000_v12 }
 0x149   : > { %v1491_v28 = vsel %vm1490_vm8, %v1489_v4, %v3913_v16  ;;  %v1559_v43 = vsel %vm1558_vm15, %v1557_v50, %v1428_v29  ;;  %v1387_v48 = vsel %vm1307_vm4, %v3739_v20, 128  ;;  %v1392_v6 = vsel %vm1312_vm5, %v3742_v23, 128 }
 0x14a   : > { %vm1492_vm11 = vcmp.lt.s32.totalorder %v1491_v28, %v3919_v2  ;;  %vm1560_vm12 = vcmp.lt.s32.totalorder %v1559_v43, %v1433_v53  ;;  %vm1342_vm13 = vcmp.eq.f32.partialorder %v5753_v31, %v4000_v12  ;;  %vm1347_vm14 = vcmp.eq.f32.partialorder %v5754_v42, %v4000_v12 }
 0x14b   : > { %v1493_v16 = vsel %vm1492_vm11, %v1491_v28, %v3919_v2  ;;  %v1561_v24 = vsel %vm1560_vm12, %v1559_v43, %v1433_v53  ;;  %vm1352_vm3 = vcmp.eq.f32.partialorder %v5755_v61, %v4000_v12  ;;  %vm1357_vm4 = vcmp.eq.f32.partialorder %v5756_v11, %v4000_v12  ;;  %v5757_v2 = vld [vmem:[#allocation32_spill] sm:$0xff]  ;;  %v4084_v53 = vpop.f32.mrf.mxu0 }
 0x14c   : > { %vm1494_vm0 = vcmp.lt.s32.totalorder %v1493_v16, %v3925_v14  ;;  %vm1562_vm1 = vcmp.lt.s32.totalorder %v1561_v24, %v1438_v15  ;;  %vm1505_vm8 = vcmp.lt.s32.totalorder %v1387_v48, %v1392_v6  ;;  %v1397_v29 = vsel %vm1317_vm6, %v3745_v63, 128 }
 0x14d   : > { %v1495_v39 = vsel %vm1494_vm0, %v1493_v16, %v3925_v14  ;;  %v1563_v60 = vsel %vm1562_vm1, %v1561_v24, %v1438_v15  ;;  %v1506_v25 = vsel %vm1505_vm8, %v1387_v48, %v1392_v6  ;;  %vm1367_vm11 = vcmp.eq.f32.partialorder %v5758_v30, %v4000_v12  ;;  %v5759_v14 = vld [vmem:[#allocation40_spill] sm:$0xff]  ;;  %v4101_v50 = vpop.f32.mrf.mxu0  ;;  %v5766_v30 = vld [vmem:[#allocation5_spill] sm:$0xff] }
 0x14e   : > { %v1496_v58 = vrot.slane %v1495_v39, 4  ;;  %vm1564_vm15 = vcmp.lt.s32.totalorder %v1563_v60, %v1443_v37  ;;  %vm1372_vm12 = vcmp.eq.f32.partialorder %v5759_v14, %v4000_v12  ;;  %vm1507_vm0 = vcmp.lt.s32.totalorder %v1506_v25, %v1397_v29 }
 0x14f   : > { %v1565_v19 = vsel %vm1564_vm15, %v1563_v60, %v1443_v37  ;;  %v1402_v15 = vsel %vm1322_vm7, %v3748_v55, 128  ;;  %v1508_v35 = vsel %vm1507_vm0, %v1506_v25, %v1397_v29  ;;  %vm1377_vm6 = vcmp.eq.f32.partialorder %v5760_v5, %v4000_v12  ;;  %v5764_v29 = vld [vmem:[#allocation3_spill] sm:$0xff]  ;;  %v5771_v5 = vld [vmem:[#allocation24_spill] sm:$0xff] }
 0x150   : > { %vm1497_vm1 = vcmp.lt.s32.totalorder %v1495_v39, %v1496_v58  ;;  %vm1566_vm5 = vcmp.lt.s32.totalorder %v1565_v19, %v1448_v49  ;;  %vm1509_vm8 = vcmp.lt.s32.totalorder %v1508_v35, %v1402_v15  ;;  %v1407_v47 = vsel %vm1327_vm2, %v3751_v41, 128 }
 0x151   : > { %v1498_v59 = vsel %vm1497_vm1, %v1495_v39, %v1496_v58  ;;  %v1567_v38 = vsel %vm1566_vm5, %v1565_v19, %v1448_v49  ;;  %v1510_v4 = vsel %vm1509_vm8, %v1508_v35, %v1402_v15  ;;  %vm1382_vm7 = vcmp.eq.f32.partialorder %v5761_v34, %v4000_v12  ;;  %v5763_v58 = vld [vmem:[#allocation2_spill] sm:$0xff]  ;;  %v5765_v19 = vld [vmem:[#allocation4_spill] sm:$0xff] }
 0x152   : > { %v1499_v37 = vrot.slane %v1498_v59, 2  ;;  %vm1568_vm15 = vcmp.lt.s32.totalorder %v1567_v38, %v4010_v36  ;;  %v1412_v49 = vsel %vm1332_vm9, %v3757_v57, 128  ;;  %vm1511_vm5 = vcmp.lt.s32.totalorder %v1510_v4, %v1407_v47  ;;  %v5768_v15 = vld [vmem:[#allocation12_spill] sm:$0xff] }
 0x153   : > { %v1569_v62 = vsel %vm1568_vm15, %v1567_v38, %v4010_v36  ;;  %v1417_v52 = vsel %vm1337_vm10, %v3760_v27, 128  ;;  %v1512_v18 = vsel %vm1511_vm5, %v1510_v4, %v1407_v47  ;;  %v1422_v43 = vsel %vm1342_vm13, %v3763_v3, 128  ;;  %v5769_v35 = vld [vmem:[#allocation16_spill] sm:$0xff]  ;;  %v5772_v47 = vld [vmem:[#allocation26_spill] sm:$0xff] }
 0x154   : > { %vm1500_vm0 = vcmp.lt.s32.totalorder %v1498_v59, %v1499_v37  ;;  %vm1570_vm1 = vcmp.lt.s32.totalorder %v1569_v62, %v4017_v54  ;;  %vm1513_vm2 = vcmp.lt.s32.totalorder %v1512_v18, %v1412_v49  ;;  %v1427_v45 = vsel %vm1347_vm14, %v3774_v40, 128  ;;  %v5770_v38 = vld [vmem:[#allocation20_spill] sm:$0xff] }
 0x155   : > { %v1501_v28 = vsel %vm1500_vm0, %v1498_v59, %v1499_v37  ;;  %v1571_v36 = vsel %vm1570_vm1, %v1569_v62, %v4017_v54  ;;  %v1432_v32 = vsel %vm1352_vm3, %v3777_v8, 128  ;;  %v1514_v48 = vsel %vm1513_vm2, %v1512_v18, %v1412_v49  ;;  %v4129_v54 = vpop.f32.mrf.mxu0  ;;  %v5774_v18 = vld [vmem:[#allocation33_spill] sm:$0xff] }
 0x156   : > { %vm1572_vm9 = vcmp.lt.s32.totalorder %v1571_v36, %v4023_v1  ;;  %v1437_v16 = vsel %vm1357_vm4, %v3780_v22, 128  ;;  %vm5762_vm10 = vcmp.eq.f32.partialorder %v5757_v2, %v4000_v12  ;;  %vm1515_vm13 = vcmp.lt.s32.totalorder %v1514_v48, %v1417_v52  ;;  %v5767_v12 = vld [vmem:[#allocation9_spill] sm:$0xff] }
 0x157   : > { %v1573_v6 = vsel %vm1572_vm9, %v1571_v36, %v4023_v1  ;;  %v1442_v24 = vsel %vm5762_vm10, %v3785_v13, 128  ;;  %v1502_v31 = vrot.slane %v1501_v28, 1  ;;  %v1447_v61 = vsel %vm1367_vm11, %v3792_v44, 128  ;;  %v915_v25 = vpop.f32.mrf.mxu0 }
 0x158   : > { %v1574_v42 = vrot.slane %v1573_v6, 4  ;;  %v1516_v39 = vsel %vm1515_vm13, %v1514_v48, %v1417_v52  ;;  %v1452_v1 = vsel %vm1372_vm12, %v3795_v46, 128  ;;  %v4152_v11 = vsel %vm1377_vm6, %v3798_v33, 128  ;;  %v5773_v52 = vld [vmem:[#allocation30_spill] sm:$0xff] }
 0x159   : > { %v4158_v60 = vsel %vm1382_vm7, %v3804_v0, 128  ;;  %vm1517_vm14 = vcmp.lt.s32.totalorder %v1516_v39, %v1422_v43  ;;  %vm1309_vm4 = vcmp.eq.f32.partialorder %v5763_v58, %v4029_v10  ;;  %vm1314_vm11 = vcmp.eq.f32.partialorder %v5764_v29, %v4029_v10  ;;  %v4190_v34 = vpop.f32.mrf.mxu0 }
 0x15a   : > { %vm1575_vm3 = vcmp.lt.s32.totalorder %v1573_v6, %v1574_v42  ;;  %v1518_v2 = vsel %vm1517_vm14, %v1516_v39, %v1422_v43  ;;  %vm1319_vm6 = vcmp.eq.f32.partialorder %v5765_v19, %v4029_v10  ;;  %vm1324_vm8 = vcmp.eq.f32.partialorder %v5766_v30, %v4029_v10  ;;  %v5776_v19 = vld [vmem:[#allocation41_spill] sm:$0xff] }
 0x15b   : > { %vm1519_vm12 = vcmp.lt.s32.totalorder %v1518_v2, %v1427_v45  ;;  %vm1329_vm15 = vcmp.eq.f32.partialorder %v5767_v12, %v4029_v10  ;;  %vm1503_vm7 = vcmp.lt.s32.totalorder %v1501_v28, %v1502_v31  ;;  %vm1334_vm5 = vcmp.eq.f32.partialorder %v5768_v15, %v4029_v10  ;;  %v925_v29 = vpop.f32.mrf.mxu0 }
 0x15c   : > { %v1520_v14 = vsel %vm1519_vm12, %v1518_v2, %v1427_v45  ;;  %vm1339_vm0 = vcmp.eq.f32.partialorder %v5769_v35, %v4029_v10  ;;  %v4174_v59 = vsel %vm1575_vm3, %v1573_v6, %v1574_v42  ;;  %vm1344_vm2 = vcmp.eq.f32.partialorder %v5770_v38, %v4029_v10 }
 0x15d   : > { %vm1521_vm1 = vcmp.lt.s32.totalorder %v1520_v14, %v1432_v32  ;;  %vm1349_vm9 = vcmp.eq.f32.partialorder %v5771_v5, %v4029_v10  ;;  %vm1354_vm10 = vcmp.eq.f32.partialorder %v5772_v47, %v4029_v10  ;;  %v1389_v4 = vsel %vm1309_vm4, %v3739_v20, 128  ;;  %v3033_v5 = vpop.f32.mrf.mxu0 }
 0x15e   : > { %v1522_v37 = vsel %vm1521_vm1, %v1520_v14, %v1432_v32  ;;  %v1394_v62 = vsel %vm1314_vm11, %v3742_v23, 128  ;;  %v4192_v49 = vsel %vm1503_vm7, %v1501_v28, %v1502_v31  ;;  %vm1359_vm14 = vcmp.eq.f32.partialorder %v5773_v52, %v4029_v10  ;;  %v5775_v32 = vld [vmem:[#allocation39_spill] sm:$0xff]  ;;  %v5779_v14 = vld [vmem:[#allocation48_spill] sm:$0xff] }
 0x15f   : > { %vm1523_vm13 = vcmp.lt.s32.totalorder %v1522_v37, %v1437_v16  ;;  %vm1364_vm3 = vcmp.eq.f32.partialorder %v5774_v18, %v4029_v10  ;;  %v1399_v36 = vsel %vm1319_vm6, %v3745_v63, 128  ;;  %v1404_v43 = vsel %vm1324_vm8, %v3748_v55, 128 }
 0x160   : > { %v1577_v28 = vrot.slane %v4174_v59, 2  ;;  %v1524_v45 = vsel %vm1523_vm13, %v1522_v37, %v1437_v16  ;;  %vm1369_vm4 = vcmp.eq.f32.partialorder %v5775_v32, %v4029_v10  ;;  %v1409_v48 = vsel %vm1329_vm15, %v3751_v41, 128 }
 0x161   : > { %v1414_v6 = vsel %vm1334_vm5, %v3757_v57, 128  ;;  %vm1525_vm11 = vcmp.lt.s32.totalorder %v1524_v45, %v1442_v24  ;;  %vm1583_vm12 = vcmp.lt.s32.totalorder %v1389_v4, %v1394_v62  ;;  %v978_v31 = vmul.f32 2.0, %v4065_v7  ;;  %v5777_v7 = vld [vmem:[#allocation45_spill] sm:$0xff] }
 0x162   : > { %v1272_v16 = vmin.f32 %v4035_v21, %v3816_v26  ;;  %v1526_v42 = vsel %vm1525_vm11, %v1524_v45, %v1442_v24  ;;  %v1419_v39 = vsel %vm1339_vm0, %v3760_v27, 128  ;;  %v1424_v2 = vsel %vm1344_vm2, %v3763_v3, 128  ;;  %v5778_v21 = vld [vmem:[#allocation11_spill] sm:$0xff] }
 0x163   : > { %v1584_v58 = vsel %vm1583_vm12, %v1389_v4, %v1394_v62  ;;  %vm1527_vm6 = vcmp.lt.s32.totalorder %v1526_v42, %v1447_v61  ;;  %vm1374_vm8 = vcmp.eq.f32.partialorder %v5776_v19, %v4029_v10  ;;  %vm1379_vm15 = vcmp.eq.f32.partialorder %v5777_v7, %v4029_v10  ;;  %v5780_v62 = vld [vmem:[#allocation18_spill] sm:$0xff]  ;;  %v5786_v7 = vld [vmem:[#allocation37_spill] sm:$0xff] }
 0x164   : > { %vm1585_vm7 = vcmp.lt.s32.totalorder %v1584_v58, %v1399_v36  ;;  %v4233_v24 = vsub.f32 %v5778_v21, %v978_v31  ;;  %v993_v30 = vmul.f32 2.0, %v4084_v53  ;;  %v1528_v12 = vsel %vm1527_vm6, %v1526_v42, %v1447_v61 }
 0x165   : > { %vm1384_vm5 = vcmp.eq.f32.partialorder %v5779_v14, %v4029_v10  ;;  %v1429_v15 = vsel %vm1349_vm9, %v3774_v40, 128  ;;  %v1586_v35 = vsel %vm1585_vm7, %v1584_v58, %v1399_v36  ;;  %v988_v38 = vmul.f32 2.0, %v4101_v50  ;;  %v5781_v50 = vld [vmem:[#allocation21_spill] sm:$0xff] }
 0x166   : > { %vm1529_vm0 = vcmp.lt.s32.totalorder %v1528_v12, %v1452_v1  ;;  %v1434_v37 = vsel %vm1354_vm10, %v3777_v8, 128  ;;  %vm1587_vm1 = vcmp.lt.s32.totalorder %v1586_v35, %v1404_v43  ;;  %v1273_v53 = vmin.f32 %v1272_v16, %v4233_v24 }
 0x167   : > { %v1530_v61 = vsel %vm1529_vm0, %v1528_v12, %v1452_v1  ;;  %v1588_v4 = vsel %vm1587_vm1, %v1586_v35, %v1404_v43  ;;  %v4249_v45 = vsub.f32 %v5780_v62, %v988_v38  ;;  %v998_v31 = vmul.f32 2.0, %v915_v25  ;;  %v5782_v1 = vld [vmem:[#allocation23_spill] sm:$0xff] }
 0x168   : > { %vm1531_vm2 = vcmp.lt.s32.totalorder %v1530_v61, %v4152_v11  ;;  %vm1589_vm9 = vcmp.lt.s32.totalorder %v1588_v4, %v1409_v48  ;;  %v4253_v36 = vsub.f32 %v5781_v50, %v993_v30  ;;  %v1274_v42 = vmin.f32 %v1273_v53, %v4042_v51  ;;  %v5783_v53 = vld [vmem:[#allocation27_spill] sm:$0xff] }
 0x169   : > { %v1532_v47 = vsel %vm1531_vm2, %v1530_v61, %v4152_v11  ;;  %v1590_v58 = vsel %vm1589_vm9, %v1588_v4, %v1409_v48  ;;  %v1003_v16 = vmul.f32 2.0, %v4129_v54  ;;  %v4259_v43 = vsub.f32 %v5782_v1, %v998_v31  ;;  %v935_v48 = vpop.f32.mrf.mxu0  ;;  %v5784_v4 = vld [vmem:[#allocation29_spill] sm:$0xff] }
 0x16a   : > { %vm1533_vm10 = vcmp.lt.s32.totalorder %v1532_v47, %v4158_v60  ;;  %vm1591_vm13 = vcmp.lt.s32.totalorder %v1590_v58, %v1414_v6  ;;  %v1275_v25 = vmin.f32 %v1274_v42, %v4249_v45  ;;  %v1008_v21 = vmul.f32 2.0, %v925_v29 }
 0x16b   : > { %v1534_v12 = vsel %vm1533_vm10, %v1532_v47, %v4158_v60  ;;  %v1439_v30 = vsel %vm1359_vm14, %v3780_v22, 128  ;;  %v1444_v54 = vsel %vm1364_vm3, %v3785_v13, 128  ;;  %v1592_v11 = vsel %vm1591_vm13, %v1590_v58, %v1414_v6 }
 0x16c   : > { %v1535_v35 = vrot.slane %v1534_v12, 4  ;;  %v1449_v29 = vsel %vm1369_vm4, %v3792_v44, 128  ;;  %vm1593_vm11 = vcmp.lt.s32.totalorder %v1592_v11, %v1419_v39  ;;  %v1276_v60 = vmin.f32 %v1275_v25, %v4253_v36 }
 0x16d   : > { %v1594_v38 = vsel %vm1593_vm11, %v1592_v11, %v1419_v39  ;;  %v4278_v52 = vsub.f32 %v5783_v53, %v1003_v16  ;;  %v1013_v61 = vmul.f32 2.0, %v4190_v34  ;;  %v4282_v18 = vsub.f32 %v5784_v4, %v1008_v21  ;;  %v5785_v16 = vld [vmem:[#allocation34_spill] sm:$0xff] }
 0x16e   : > { %vm1536_vm14 = vcmp.lt.s32.totalorder %v1534_v12, %v1535_v35  ;;  %vm1595_vm3 = vcmp.lt.s32.totalorder %v1594_v38, %v1424_v2  ;;  %v1277_v6 = vmin.f32 %v1276_v60, %v4259_v43  ;;  %v1018_v62 = vmul.f32 2.0, %v935_v48 }
 0x16f   : > { %v1537_v31 = vsel %vm1536_vm14, %v1534_v12, %v1535_v35  ;;  %v1454_v32 = vsel %vm1374_vm8, %v3795_v46, 128  ;;  %v1459_v39 = vsel %vm1379_vm15, %v3798_v33, 128  ;;  %v1596_v34 = vsel %vm1595_vm3, %v1594_v38, %v1424_v2  ;;  %v5789_v12 = vld [vmem:[#allocation43_spill] sm:$0xff] }
 0x170   : > { %v1538_v50 = vrot.slane %v1537_v31, 2  ;;  %v4297_v42 = vsel %vm1384_vm5, %v3804_v0, 128  ;;  %vm1597_vm4 = vcmp.lt.s32.totalorder %v1596_v34, %v1429_v15  ;;  %v1278_v47 = vmin.f32 %v1277_v6, %v4278_v52 }
 0x171   : > { %v1598_v58 = vsel %vm1597_vm4, %v1596_v34, %v1429_v15  ;;  %v4301_v19 = vsub.f32 %v5785_v16, %v1013_v61  ;;  %v1023_v1 = vmul.f32 2.0, %v3033_v5  ;;  %vm1736_vm12 = vcmp.eq.s32.totalorder %v3804_v0, %v4192_v49 }
 0x172   : > { %vm1539_vm6 = vcmp.lt.s32.totalorder %v1537_v31, %v1538_v50  ;;  %vm1599_vm8 = vcmp.lt.s32.totalorder %v1598_v58, %v1434_v37  ;;  %v1279_v2 = vmin.f32 %v1278_v47, %v4282_v18  ;;  %v4307_v25 = vsub.f32 %v5786_v7, %v1018_v62 }
 0x173   : > { %v1540_v10 = vsel %vm1539_vm6, %v1537_v31, %v1538_v50  ;;  %v1600_v14 = vsel %vm1599_vm8, %v1598_v58, %v1434_v37  ;;  %vm1731_vm15 = vcmp.eq.s32.totalorder %v3798_v33, %v4192_v49  ;;  %vm1726_vm7 = vcmp.eq.s32.totalorder %v3795_v46, %v4192_v49 }
 0x174   : > { %v1541_v15 = vrot.slane %v1540_v10, 1  ;;  %vm1601_vm5 = vcmp.lt.s32.totalorder %v1600_v14, %v1439_v30  ;;  %v1280_v5 = vmin.f32 %v1279_v2, %v4301_v19  ;;  %vm1721_vm0 = vcmp.eq.s32.totalorder %v3792_v44, %v4192_v49 }
 0x175   : > { %vm4319_vm1 = vcmp.lt.s32.totalorder %v4174_v59, %v1577_v28  ;;  %v1602_v37 = vsel %vm1601_vm5, %v1600_v14, %v1439_v30  ;;  %v4324_v11 = vsub.f32 %v5789_v12, %v1023_v1  ;;  %v5790_v48 = vmov 0.0  }
 0x176   : > { %v2873_v35 = vsel %vm1736_vm12, 1.0, %v5790_v48  ;;  %vm1716_vm2 = vcmp.eq.s32.totalorder %v3785_v13, %v4192_v49  ;;  %vm1542_vm9 = vcmp.lt.s32.totalorder %v1540_v10, %v1541_v15  ;;  %vm1603_vm10 = vcmp.lt.s32.totalorder %v1602_v37, %v1444_v54 }
 0x177   : > { %v1281_v60 = vmin.f32 %v1280_v5, %v4307_v25  ;;  %v2868_v30 = vsel %vm1731_vm15, 1.0, %v5790_v48  ;;  %v4337_v38 = vsel %vm1542_vm9, %v1540_v10, %v1541_v15  ;;  %v1604_v53 = vsel %vm1603_vm10, %v1602_v37, %v1444_v54 }
 0x178   : > { %v2863_v61 = vsel %vm1726_vm7, 1.0, %v5790_v48  ;;  %v2858_v4 = vsel %vm1721_vm0, 1.0, %v5790_v48  ;;  %vm1605_vm13 = vcmp.lt.s32.totalorder %v1604_v53, %v1449_v29  ;;  %vm1737_vm11 = vcmp.eq.s32.totalorder %v3804_v0, %v4337_v38 }
 0x179   : > { %v1282_v6 = vmin.f32 %v1281_v60, %v4324_v11  ;;  %v2853_v54 = vsel %vm1716_vm2, 1.0, %v5790_v48  ;;  %v1606_v62 = vsel %vm1605_vm13, %v1604_v53, %v1449_v29  ;;  %v2874_v31 = vsel %vm1737_vm11, 1.0, %v5790_v48 }
 0x17a   : > { %v3152_v34 = vmov 1.0   ;;  %vm1732_vm14 = vcmp.eq.s32.totalorder %v3798_v33, %v4337_v38  ;;  %vm1727_vm3 = vcmp.eq.s32.totalorder %v3795_v46, %v4337_v38  ;;  %vm1607_vm4 = vcmp.lt.s32.totalorder %v1606_v62, %v1454_v32 }
 0x17b   : > { %2878 = vmatprep.subr.msk.mxu1 %vm1737_vm11, %v3152_v34  ;;  %v1283_v50 = vrot.slane %v1282_v6, 4  ;;  %v4360_v47 = vadd.f32 %v2874_v31, %v2873_v35  ;;  %vm1711_vm6 = vcmp.eq.s32.totalorder %v3780_v22, %v4192_v49  ;;  %v1608_v29 = vsel %vm1607_vm4, %v1606_v62, %v1454_v32 }
 0x17c   : > { %2879 = vmatpush1.msk.msra.mxu1 %vm1736_vm12, %v3152_v34  ;;  %v2869_v58 = vsel %vm1732_vm14, 1.0, %v5790_v48  ;;  %v2864_v16 = vsel %vm1727_vm3, 1.0, %v5790_v48  ;;  %vm1722_vm8 = vcmp.eq.s32.totalorder %v3792_v44, %v4337_v38  ;;  %vm1609_vm5 = vcmp.lt.s32.totalorder %v1608_v29, %v1459_v39 }
 0x17d   : > { %2880 = vmatprep.subr.msk.mxu1 %vm1732_vm14, %v3152_v34  ;;  %v1284_v1 = vmin.f32 %v1282_v6, %v1283_v50  ;;  %v4376_v2 = vadd.f32 %v2869_v58, %v2868_v30  ;;  %v4382_v32 = vadd.f32 %v2864_v16, %v2863_v61  ;;  %v1610_v7 = vsel %vm1609_vm5, %v1608_v29, %v1459_v39 }
 0x17e   : > { %2881 = vmatpush1.msk.msra.mxu1 %vm1731_vm15, %v3152_v34  ;;  %v2859_v10 = vsel %vm1722_vm8, 1.0, %v5790_v48  ;;  %vm1717_vm12 = vcmp.eq.s32.totalorder %v3785_v13, %v4337_v38  ;;  %vm1712_vm9 = vcmp.eq.s32.totalorder %v3780_v22, %v4337_v38  ;;  %vm1611_vm15 = vcmp.lt.s32.totalorder %v1610_v7, %v4297_v42 }
 0x17f   : > { %2882 = vmatprep.subr.msk.mxu1 %vm1727_vm3, %v3152_v34  ;;  %v1285_v14 = vrot.slane %v1284_v1, 2  ;;  %v4401_v39 = vadd.f32 %v2859_v10, %v2858_v4  ;;  %v2854_v15 = vsel %vm1717_vm12, 1.0, %v5790_v48  ;;  %v1612_v5 = vsel %vm1611_vm15, %v1610_v7, %v4297_v42 }
 0x180   : > { %2883 = vmatpush1.msk.msra.mxu1 %vm1726_vm7, %v3152_v34  ;;  %v4412_v37 = vadd.f32 %v2854_v15, %v2853_v54  ;;  %v2848_v12 = vsel %vm1711_vm6, 1.0, %v5790_v48  ;;  %v2849_v35 = vsel %vm1712_vm9, 1.0, %v5790_v48  ;;  %v1579_v42 = vsel %vm4319_vm1, %v4174_v59, %v1577_v28 }
 0x181   : > { %2884 = vmatprep.subr.msk.mxu1 %vm1722_vm8, %v3152_v34  ;;  %v1613_v60 = vrot.slane %v1612_v5, 4  ;;  %v1286_v30 = vmin.f32 %v1284_v1, %v1285_v14  ;;  %v4431_v53 = vadd.f32 %v2849_v35, %v2848_v12  ;;  %v3153_v61 = vmov 1966171168   ;;  %v5791_v14 = vld [vmem:[#allocation49_spill] sm:$0xff] }
 0x182   : > { %2885 = vmatpush1.msk.msra.mxu1 %vm1721_vm0, %v3152_v34  ;;  %v2187_v4 = vunpack.c.l.s4 %v3153_v61  ;;  %vm1706_vm7 = vcmp.eq.s32.totalorder %v3777_v8, %v4192_v49  ;;  %vm1707_vm1 = vcmp.eq.s32.totalorder %v3777_v8, %v4337_v38  ;;  %vm1701_vm10 = vcmp.eq.s32.totalorder %v3774_v40, %v4192_v49 }
 0x183   : > { %2886 = vmatprep.subr.msk.mxu1 %vm1717_vm12, %v3152_v34  ;;  %vm1614_vm13 = vcmp.lt.s32.totalorder %v1612_v5, %v1613_v60  ;;  %v1287_v59 = vrot.slane %v1286_v30, 1  ;;  %v2843_v28 = vsel %vm1706_vm7, 1.0, %v5790_v48  ;;  %v2844_v21 = vsel %vm1707_vm1, 1.0, %v5790_v48 }
 0x184   : > { %2887 = vmatpush1.msk.msra.mxu1 %vm1716_vm2, %v3152_v34  ;;  %v1580_v6 = vrot.slane %v1579_v42, 1  ;;  %v1615_v54 = vsel %vm1614_vm13, %v1612_v5, %v1613_v60  ;;  %v4459_v62 = vadd.f32 %v2844_v21, %v2843_v28  ;;  %vm1702_vm0 = vcmp.eq.s32.totalorder %v3774_v40, %v4337_v38 }
 0x185   : > { %2888 = vmatprep.subr.msk.mxu1 %vm1712_vm9, %v3152_v34  ;;  %v1616_v31 = vrot.slane %v1615_v54, 2  ;;  %v2838_v50 = vsel %vm1701_vm10, 1.0, %v5790_v48  ;;  %v2839_v29 = vsel %vm1702_vm0, 1.0, %v5790_v48  ;;  %v4472_v58 = vmin.f32 %v1286_v30, %v1287_v59 }
 0x186   : > { %2889 = vmatpush1.msk.msra.mxu1 %vm1711_vm6, %v3152_v34  ;;  %v4478_v16 = vadd.f32 %v2839_v29, %v2838_v50  ;;  %v2188_v1 = vunpack.c.0.s8 %v2187_v4  ;;  %vm1581_vm11 = vcmp.lt.s32.totalorder %v1579_v42, %v1580_v6  ;;  %vm5670_vm14 = vcmp.eq.s32.totalorder %v3763_v3, %v4337_v38 }
 0x187   : > { %2890 = vmatprep.subr.msk.mxu1 %vm1707_vm1, %v3152_v34  ;;  %vm1617_vm2 = vcmp.lt.s32.totalorder %v1615_v54, %v1616_v31  ;;  %vm1310_vm3 = vcmp.eq.f32.partialorder %v3754_v17, %v4472_v58  ;;  %vm1315_vm4 = vcmp.eq.f32.partialorder %v5791_v14, %v4472_v58  ;;  %vm5668_vm6 = vcmp.eq.s32.totalorder %v3763_v3, %v4192_v49 }
 0x188   : > { %2891 = vmatpush1.msk.msra.mxu1 %vm1706_vm7, %v3152_v34  ;;  %v1618_v7 = vsel %vm1617_vm2, %v1615_v54, %v1616_v31  ;;  %v4501_v15 = vsel %vm1581_vm11, %v1579_v42, %v1580_v6  ;;  %v2184_v5 = vcombine.low %v4192_v49, %v4337_v38  ;;  %v4506_v12 = vsub.s32 %v2188_v1, %v3739_v20  ;;  %v5792_v42 = vld [vmem:[#allocation50_spill] sm:$0xff] }
 0x189   : > { %2892 = vmatprep.subr.msk.mxu1 %vm1702_vm0, %v3152_v34  ;;  %v1619_v10 = vrot.slane %v1618_v7, 1  ;;  %v1390_v17 = vsel %vm1310_vm3, %v3739_v20, 128  ;;  %v1395_v35 = vsel %vm1315_vm4, %v3742_v23, 128  ;;  %vm1320_vm5 = vcmp.eq.f32.partialorder %v5792_v42, %v4472_v58 }
 0x18a   : > { %2893 = vmatpush1.msk.msra.mxu1 %vm1701_vm10, %v3152_v34  ;;  %vm5678_vm12 = vcmp.eq.s32.totalorder %v3804_v0, %v4501_v15  ;;  %v4521_v30 = vrot.slane %v2184_v5, %v4506_v12  ;;  %vm1325_vm9 = vcmp.eq.f32.partialorder %v3813_v56, %v4472_v58  ;;  %vm5672_vm15 = vcmp.eq.s32.totalorder %v3798_v33, %v4501_v15 }
 0x18b   : > { %2894 = vmatprep.subr.msk.mxu1 %vm5670_vm14, %v3152_v34  ;;  %vm1620_vm8 = vcmp.lt.s32.totalorder %v1618_v7, %v1619_v10  ;;  %vm5674_vm7 = vcmp.eq.s32.totalorder %v3795_v46, %v4501_v15  ;;  %vm1330_vm1 = vcmp.eq.f32.partialorder %v3821_v9, %v4472_v58  ;;  %vm1335_vm10 = vcmp.eq.f32.partialorder %v3816_v26, %v4472_v58 }
 0x18c   : > { %2895 = vmatpush1.msk.msra.mxu1 %vm5668_vm6, %v3152_v34  ;;  %v4514_v60 = vsel %vm1620_vm8, %v1618_v7, %v1619_v10  ;;  %vm1340_vm13 = vcmp.eq.f32.partialorder %v4233_v24, %v4472_v58  ;;  %vm1622_vm0 = vcmp.lt.s32.totalorder %v1390_v17, %v1395_v35  ;;  %vm5677_vm2 = vcmp.eq.s32.totalorder %v3792_v44, %v4501_v15 }
 0x18d   : > { %vm1345_vm11 = vcmp.eq.f32.partialorder %v4042_v51, %v4472_v58  ;;  %v1400_v61 = vsel %vm1320_vm5, %v3745_v63, 128  ;;  %v1623_v4 = vsel %vm1622_vm0, %v1390_v17, %v1395_v35  ;;  %vm5669_vm3 = vcmp.eq.s32.totalorder %v3804_v0, %v4514_v60 }
 0x18e   : > { %v2185_v59 = vcombine.low %v4501_v15, %v4514_v60  ;;  %vm1350_vm4 = vcmp.eq.f32.partialorder %v4249_v45, %v4472_v58  ;;  %vm1624_vm6 = vcmp.lt.s32.totalorder %v1623_v4, %v1400_v61  ;;  %2910 = vmatprep.subr.msk.mxu0 %vm5669_vm3, %v3152_v34  ;;  %v1405_v28 = vsel %vm1325_vm9, %v3748_v55, 128 }
 0x18f   : > { %v1625_v21 = vsel %vm1624_vm6, %v1623_v4, %v1400_v61  ;;  %2911 = vmatpush1.msk.msra.mxu0 %vm5678_vm12, %v3152_v34  ;;  %vm5671_vm3 = vcmp.eq.s32.totalorder %v3798_v33, %v4514_v60  ;;  %vm1365_vm14 = vcmp.eq.f32.partialorder %v4278_v52, %v4472_v58  ;;  %vm1370_vm0 = vcmp.eq.f32.partialorder %v4282_v18, %v4472_v58 }
 0x190   : > { %vm1375_vm5 = vcmp.eq.f32.partialorder %v4301_v19, %v4472_v58  ;;  %vm1626_vm8 = vcmp.lt.s32.totalorder %v1625_v21, %v1405_v28  ;;  %2912 = vmatprep.subr.msk.mxu0 %vm5671_vm3, %v3152_v34  ;;  %vm5685_vm6 = vcmp.eq.s32.totalorder %v3780_v22, %v4501_v15  ;;  %v1410_v56 = vsel %vm1330_vm1, %v3751_v41, 128 }
 0x191   : > { %v1627_v6 = vsel %vm1626_vm8, %v1625_v21, %v1405_v28  ;;  %2913 = vmatpush1.msk.msra.mxu0 %vm5672_vm15, %v3152_v34  ;;  %vm5673_vm9 = vcmp.eq.s32.totalorder %v3795_v46, %v4514_v60  ;;  %vm1691_vm3 = vcmp.eq.s32.totalorder %v3760_v27, %v4192_v49  ;;  %v4591_v54 = vrot.slane %v2185_v59, %v4506_v12 }
 0x192   : > { %v1415_v9 = vsel %vm1335_vm10, %v3757_v57, 128  ;;  %vm1628_vm1 = vcmp.lt.s32.totalorder %v1627_v6, %v1410_v56  ;;  %2914 = vmatprep.subr.msk.mxu0 %vm5673_vm9, %v3152_v34  ;;  %vm5681_vm8 = vcmp.eq.s32.totalorder %v3777_v8, %v4501_v15  ;;  %vm1692_vm15 = vcmp.eq.s32.totalorder %v3760_v27, %v4337_v38 }
 0x193   : > { %v1629_v31 = vsel %vm1628_vm1, %v1627_v6, %v1410_v56  ;;  %2915 = vmatpush1.msk.msra.mxu0 %vm5674_vm7, %v3152_v34  ;;  %vm5676_vm10 = vcmp.eq.s32.totalorder %v3792_v44, %v4514_v60  ;;  %v2828_v26 = vsel %vm1691_vm3, 1.0, %v5790_v48  ;;  %v2829_v50 = vsel %vm1692_vm15, 1.0, %v5790_v48  ;;  %2896 = vmatprep.subr.msk.mxu1 %vm1692_vm15, %v3152_v34 }
 0x194   : > { %v1420_v29 = vsel %vm1340_vm13, %v3760_v27, 128  ;;  %vm1630_vm1 = vcmp.lt.s32.totalorder %v1629_v31, %v1415_v9  ;;  %2916 = vmatprep.subr.msk.mxu0 %vm5676_vm10, %v3152_v34  ;;  %vm1703_vm9 = vcmp.eq.s32.totalorder %v3774_v40, %v4501_v15  ;;  %v4627_v1 = vadd.f32 %v2829_v50, %v2828_v26  ;;  %2897 = vmatpush1.msk.msra.mxu1 %vm1691_vm3, %v3152_v34 }
 0x195   : > { %vm1687_vm15 = vcmp.eq.s32.totalorder %v3757_v57, %v4337_v38  ;;  %v1425_v24 = vsel %vm1345_vm11, %v3763_v3, 128  ;;  %v1631_v7 = vsel %vm1630_vm1, %v1629_v31, %v1415_v9  ;;  %2917 = vmatpush1.msk.msra.mxu0 %vm5677_vm2, %v3152_v34  ;;  %vm5675_vm13 = vcmp.eq.s32.totalorder %v3785_v13, %v4514_v60 }
 0x196   : > { %vm1686_vm3 = vcmp.eq.s32.totalorder %v3757_v57, %v4192_v49  ;;  %2898 = vmatprep.subr.msk.mxu1 %vm1687_vm15, %v3152_v34  ;;  %v1430_v51 = vsel %vm1350_vm4, %v3774_v40, 128  ;;  %vm5793_vm11 = vcmp.eq.f32.partialorder %v4253_v36, %v4472_v58  ;;  %vm1632_vm1 = vcmp.lt.s32.totalorder %v1631_v7, %v1420_v29  ;;  %2918 = vmatprep.subr.msk.mxu0 %vm5675_vm13, %v3152_v34 }
 0x197   : > { %v1435_v10 = vsel %vm5793_vm11, %v3777_v8, 128  ;;  %vm5683_vm7 = vcmp.eq.s32.totalorder %v3763_v3, %v4501_v15  ;;  %2899 = vmatpush1.msk.msra.mxu1 %vm1686_vm3, %v3152_v34  ;;  %vm1681_vm4 = vcmp.eq.s32.totalorder %v3751_v41, %v4192_v49  ;;  %v2207_v45 = vcombine.low %v4521_v30, %v4591_v54 }
 0x198   : > { %v1633_v36 = vsel %vm1632_vm1, %v1631_v7, %v1420_v29  ;;  %vm5794_vm11 = vcmp.eq.s32.totalorder %v3785_v13, %v4501_v15  ;;  %vm5679_vm13 = vcmp.eq.s32.totalorder %v3780_v22, %v4514_v60  ;;  %vm1682_vm10 = vcmp.eq.s32.totalorder %v3751_v41, %v4337_v38 }
 0x199   : > { %2919 = vmatpush1.msk.msra.mxu0 %vm5794_vm11, %v3152_v34  ;;  %vm1380_vm2 = vcmp.eq.f32.partialorder %v4307_v25, %v4472_v58  ;;  %vm1634_vm12 = vcmp.lt.s32.totalorder %v1633_v36, %v1425_v24  ;;  %vm5680_vm1 = vcmp.eq.s32.totalorder %v3777_v8, %v4514_v60  ;;  %v2818_v14 = vsel %vm1681_vm4, 1.0, %v5790_v48  ;;  %2900 = vmatprep.subr.msk.mxu1 %vm1682_vm10, %v3152_v34 }
 0x19a   : > { %2920 = vmatprep.subr.msk.mxu0 %vm5679_vm13, %v3152_v34  ;;  %v2819_v5 = vsel %vm1682_vm10, 1.0, %v5790_v48  ;;  %vm5795_vm11 = vcmp.eq.f32.partialorder %v4259_v43, %v4472_v58  ;;  %v1635_v35 = vsel %vm1634_vm12, %v1633_v36, %v1425_v24  ;;  %2901 = vmatpush1.msk.msra.mxu1 %vm1681_vm4, %v3152_v34  ;;  %vm1677_vm10 = vcmp.eq.s32.totalorder %v3748_v55, %v4337_v38  ;;  %v4826_v24 = vld [vmem:[%s5574_s2] sm:$0xff] }
 0x19b   : > { %v1440_v17 = vsel %vm5795_vm11, %v3780_v22, 128  ;;  %2921 = vmatpush1.msk.msra.mxu0 %vm5685_vm6, %v3152_v34  ;;  %v4703_v42 = vadd.f32 %v2819_v5, %v2818_v14  ;;  %vm1385_vm13 = vcmp.eq.f32.partialorder %v4324_v11, %v4472_v58  ;;  %v1445_v43 = vsel %vm1365_vm14, %v3785_v13, 128  ;;  %2902 = vmatprep.subr.msk.mxu1 %vm1677_vm10, %v3152_v34 }
 0x19c   : > { %v1450_v30 = vsel %vm1370_vm0, %v3792_v44, 128  ;;  %vm1636_vm12 = vcmp.lt.s32.totalorder %v1635_v35, %v1430_v51  ;;  %2922 = vmatprep.subr.msk.mxu0 %vm5680_vm1, %v3152_v34  ;;  %vm1676_vm4 = vcmp.eq.s32.totalorder %v3748_v55, %v4192_v49  ;;  %v1455_v52 = vsel %vm1375_vm5, %v3795_v46, 128 }
 0x19d   : > { %v1637_v18 = vsel %vm1636_vm12, %v1635_v35, %v1430_v51  ;;  %2923 = vmatpush1.msk.msra.mxu0 %vm5681_vm8, %v3152_v34  ;;  %vm5686_vm14 = vcmp.eq.s32.totalorder %v3774_v40, %v4514_v60  ;;  %2903 = vmatpush1.msk.msra.mxu1 %vm1676_vm4, %v3152_v34  ;;  %vm1671_vm0 = vcmp.eq.s32.totalorder %v3745_v63, %v4192_v49  ;;  %v5797_v31 = vlaneseq  ;;  %v4887_v35 = vld [vmem:[%s5574_s2 + $0x8] sm:$0xff] }
 0x19e   : > { %v4748_v19 = vrot.slane %v2207_v45, %v4506_v12  ;;  %vm1638_vm5 = vcmp.lt.s32.totalorder %v1637_v18, %v1435_v10  ;;  %2924 = vmatprep.subr.msk.mxu0 %vm5686_vm14, %v3152_v34  ;;  %vm5682_vm11 = vcmp.eq.s32.totalorder %v3763_v3, %v4514_v60  ;;  %vm1672_vm12 = vcmp.eq.s32.totalorder %v3745_v63, %v4337_v38 }
 0x19f   : > { %v1639_v61 = vsel %vm1638_vm5, %v1637_v18, %v1435_v10  ;;  %2925 = vmatpush1.msk.msra.mxu0 %vm1703_vm9, %v3152_v34  ;;  %v2808_v4 = vsel %vm1671_vm0, 1.0, %v5790_v48  ;;  %v2809_v59 = vsel %vm1672_vm12, 1.0, %v5790_v48  ;;  %2904 = vmatprep.subr.msk.mxu1 %vm1672_vm12, %v3152_v34  ;;  %vm1666_vm1 = vcmp.eq.s32.totalorder %v3742_v23, %v4192_v49 }
 0x1a0   : > { %vm1640_vm8 = vcmp.lt.s32.totalorder %v1639_v61, %v1440_v17  ;;  %vm5796_vm5 = vcmp.eq.s32.totalorder %v3763_v3, %v4337_v38  ;;  %2926 = vmatprep.subr.msk.mxu0 %vm5682_vm11, %v3152_v34  ;;  %v4778_v21 = vadd.f32 %v2809_v59, %v2808_v4  ;;  %2905 = vmatpush1.msk.msra.mxu1 %vm1671_vm0, %v3152_v34  ;;  %v2803_v6 = vsel %vm1666_vm1, 1.0, %v5790_v48 }
 0x1a1   : > { %v2834_v28 = vsel %vm5796_vm5, 1.0, %v5790_v48  ;;  %vm1667_vm12 = vcmp.eq.s32.totalorder %v3742_v23, %v4337_v38  ;;  %v1641_v56 = vsel %vm1640_vm8, %v1639_v61, %v1440_v17  ;;  %2927 = vmatpush1.msk.msra.mxu0 %vm5683_vm7, %v3152_v34  ;;  %vm5687_vm5 = vcmp.eq.s32.totalorder %v3760_v27, %v4514_v60  ;;  %v4938_v61 = vld [vmem:[%s5574_s2 + $0x10] sm:$0xff] }
 0x1a2   : > { %v2804_v54 = vsel %vm1667_vm12, 1.0, %v5790_v48  ;;  %2906 = vmatprep.subr.msk.mxu1 %vm1667_vm12, %v3152_v34  ;;  %vm1642_vm0 = vcmp.lt.s32.totalorder %v1641_v56, %v1445_v43  ;;  %2928 = vmatprep.subr.msk.mxu0 %vm5687_vm5, %v3152_v34  ;;  %vm1693_vm8 = vcmp.eq.s32.totalorder %v3760_v27, %v4501_v15  ;;  %v2230_v26 = vand.u32 127, %v5797_v31 }
 0x1a3   : > { %v4804_v9 = vadd.f32 %v2804_v54, %v2803_v6  ;;  %2907 = vmatpush1.msk.msra.mxu1 %vm1666_vm1, %v3152_v34  ;;  %v1643_v50 = vsel %vm1642_vm0, %v1641_v56, %v1445_v43  ;;  %vm5798_vm12 = vcmp.eq.s32.totalorder %v3763_v3, %v4192_v49  ;;  %2929 = vmatpush1.msk.msra.mxu0 %vm1693_vm8, %v3152_v34  ;;  %v2824_v7 = vsel %vm1687_vm15, 1.0, %v5790_v48 }
 0x1a4   : > { %v2833_v29 = vsel %vm5798_vm12, 1.0, %v5790_v48  ;;  %vm5684_vm11 = vcmp.eq.s32.totalorder %v3757_v57, %v4514_v60  ;;  %vm1662_vm7 = vcmp.eq.s32.totalorder %v3739_v20, %v4337_v38  ;;  %vm1644_vm1 = vcmp.lt.s32.totalorder %v1643_v50, %v1450_v30 }
 0x1a5   : > { %2930 = vmatprep.subr.msk.mxu0 %vm5684_vm11, %v3152_v34  ;;  %vm1688_vm0 = vcmp.eq.s32.totalorder %v3757_v57, %v4501_v15  ;;  %vm1661_vm12 = vcmp.eq.s32.totalorder %v3739_v20, %v4192_v49  ;;  %2908 = vmatprep.subr.msk.mxu1 %vm1662_vm7, %v3152_v34  ;;  %v1460_v51 = vsel %vm1380_vm2, %v3798_v33, 128  ;;  %v1645_v10 = vsel %vm1644_vm1, %v1643_v50, %v1450_v30 }
 0x1a6   : > { %v4848_v45 = vadd.f32 %v2834_v28, %v2833_v29  ;;  %2931 = vmatpush1.msk.msra.mxu0 %vm1688_vm0, %v3152_v34  ;;  %vm1684_vm15 = vcmp.eq.s32.totalorder %v3751_v41, %v4514_v60  ;;  %2909 = vmatpush1.msk.msra.mxu1 %vm1661_vm12, %v3152_v34  ;;  %vm1646_vm11 = vcmp.lt.s32.totalorder %v1645_v10, %v1455_v52  ;;  %v2823_v25 = vsel %vm1686_vm3, 1.0, %v5790_v48 }
 0x1a7   : > { %2932 = vmatprep.subr.msk.mxu0 %vm1684_vm15, %v3152_v34  ;;  %vm1683_vm2 = vcmp.eq.s32.totalorder %v3751_v41, %v4501_v15  ;;  %1966 = vmatmul.mubr.f32.vlgmr.msra.gmra.mxu1 %v4826_v24  ;;  %v2234_v36 = vadd.s32 512, %v2230_v26  ;;  %v1465_v14 = vsel %vm1385_vm13, %v3804_v0, 128  ;;  %v1647_v5 = vsel %vm1646_vm11, %v1645_v10, %v1455_v52  ;;  %v4996_v10 = vld [vmem:[%s5574_s2 + $0x18] sm:$0xff] }
 0x1a8   : > { %v4875_v17 = vadd.f32 %v2824_v7, %v2823_v25  ;;  %2933 = vmatpush1.msk.msra.mxu0 %vm1683_vm2, %v3152_v34  ;;  %vm1679_vm3 = vcmp.eq.s32.totalorder %v3748_v55, %v4514_v60  ;;  %1971 = vmatprep.mubr.f32.mxu1 %v5790_v48  ;;  %vm1648_vm1 = vcmp.lt.s32.totalorder %v1647_v5, %v1460_v51  ;;  %v2814_v11 = vsel %vm1677_vm10, 1.0, %v5790_v48 }
 0x1a9   : > { %2934 = vmatprep.subr.msk.mxu0 %vm1679_vm3, %v3152_v34  ;;  %vm1678_vm13 = vcmp.eq.s32.totalorder %v3748_v55, %v4501_v15  ;;  %v2799_v58 = vsel %vm1662_vm7, 1.0, %v5790_v48  ;;  %v1649_v43 = vsel %vm1648_vm1, %v1647_v5, %v1460_v51  ;;  %vm1674_vm10 = vcmp.eq.s32.totalorder %v3745_v63, %v4514_v60 }
 0x1aa   : > { %2935 = vmatpush1.msk.msra.mxu0 %vm1678_vm13, %v3152_v34  ;;  %vm1673_vm11 = vcmp.eq.s32.totalorder %v3745_v63, %v4501_v15  ;;  %vm1664_vm6 = vcmp.eq.s32.totalorder %v3739_v20, %v4514_v60  ;;  %vm1650_vm14 = vcmp.lt.s32.totalorder %v1649_v43, %v1465_v14  ;;  %v2798_v38 = vsel %vm1661_vm12, 1.0, %v5790_v48 }
 0x1ab   : > { %2936 = vmatprep.subr.msk.mxu0 %vm1674_vm10, %v3152_v34  ;;  %vm1663_vm7 = vcmp.eq.s32.totalorder %v3739_v20, %v4501_v15  ;;  %vm2245_vm1 = vcmp.lt.s32.totalorder %v2234_v36, 576  ;;  %1972 = vmatmul.mubr.f32.gmra.mxu1 %v4887_v35  ;;  %v1651_v30 = vsel %vm1650_vm14, %v1649_v43, %v1465_v14  ;;  %v2813_v52 = vsel %vm1676_vm4, 1.0, %v5790_v48 }
 0x1ac   : > { %2937 = vmatpush1.msk.msra.mxu0 %vm1673_vm11, %v3152_v34  ;;  %vm1669_vm12 = vcmp.eq.s32.totalorder %v3742_v23, %v4514_v60  ;;  %v2376_v18 = vadd.f32 %v2799_v58, %v2798_v38  ;;  %1977 = vmatprep.mubr.f32.mxu1 %v5790_v48  ;;  %v1652_v4 = vrot.slane %v1651_v30, 4  ;;  %v2394_v59 = vadd.f32 %v2814_v11, %v2813_v52 }
 0x1ad   : > { %2938 = vmatprep.subr.msk.mxu0 %vm1669_vm12, %v3152_v34  ;;  %vm1668_vm4 = vcmp.eq.s32.totalorder %v3742_v23, %v4501_v15  ;;  %v4950_v49 = vsel %vm1664_vm6, 1.0, %v5790_v48  ;;  %v2800_v28 = vsel %vm1663_vm7, 1.0, %v5790_v48  ;;  %v4962_v56 = vsel %vm2245_vm1, 1.0, %v5790_v48 }
 0x1ae   : > { %2939 = vmatpush1.msk.msra.mxu0 %vm1668_vm4, %v3152_v34  ;;  %v2815_v6 = vsel %vm1678_vm13, 1.0, %v5790_v48  ;;  %vm5799_vm14 = vcmp.eq.s32.totalorder %v3804_v0, %v4501_v15  ;;  %vm1653_vm5 = vcmp.lt.s32.totalorder %v1651_v30, %v1652_v4  ;;  %v4980_v26 = vsel %vm1679_vm3, 1.0, %v5790_v48 }
 0x1af   : > { %v2875_v54 = vsel %vm5799_vm14, 1.0, %v5790_v48  ;;  %2940 = vmatprep.subr.msk.mxu0 %vm1664_vm6, %v3152_v34  ;;  %v2825_v50 = vsel %vm1688_vm0, 1.0, %v5790_v48  ;;  %1978 = vmatmul.mubr.f32.gmra.mxu1 %v4938_v61  ;;  %v1654_v7 = vsel %vm1653_vm5, %v1651_v30, %v1652_v4  ;;  %v2377_v51 = vadd.f32 %v2800_v28, %v2376_v18 }
 0x1b0   : > { %v2467_v29 = vadd.f32 %v2875_v54, %v4360_v47  ;;  %2941 = vmatpush1.msk.msra.mxu0 %vm1663_vm7, %v3152_v34  ;;  %1983 = vmatprep.mubr.f32.mxu1 %v5790_v48  ;;  %vm5800_vm6 = vcmp.eq.s32.totalorder %v3804_v0, %v4514_v60  ;;  %v2805_v47 = vsel %vm1668_vm4, 1.0, %v5790_v48  ;;  %v1655_v36 = vrot.slane %v1654_v7, 2 }
 0x1b1   : > { %v2876_v25 = vsel %vm5800_vm6, 1.0, %v5790_v48  ;;  %v2395_v14 = vadd.f32 %v2815_v6, %v2394_v59  ;;  %2055 = vmatmul.mubr.f32.vlgmr.msra.gmra.mxu0 %v4826_v24  ;;  %v2383_v11 = vadd.f32 %v2805_v47, %v4804_v9  ;;  %v2806_v58 = vsel %vm1669_vm12, 1.0, %v5790_v48 }
 0x1b2   : > { %v5007_v5 = vadd.f32 %v2876_v25, %v2467_v29  ;;  %2060 = vmatprep.mubr.f32.mxu0 %v5790_v48  ;;  %v2810_v43 = vsel %vm1673_vm11, 1.0, %v5790_v48  ;;  %v2811_v38 = vsel %vm1674_vm10, 1.0, %v5790_v48  ;;  %v2820_v9 = vsel %vm1683_vm2, 1.0, %v5790_v48 }
 0x1b3   : > { %vm1656_vm5 = vcmp.lt.s32.totalorder %v1654_v7, %v1655_v36  ;;  %1984 = vmatmul.mubr.f32.gmra.mxu1 %v4996_v10  ;;  %v5028_v30 = vadd.f32 %v2806_v58, %v2383_v11  ;;  %v2389_v52 = vadd.f32 %v2810_v43, %v4778_v21  ;;  %v2401_v18 = vadd.f32 %v2820_v9, %v4703_v42 }
 0x1b4   : > { %v1657_v4 = vsel %vm1656_vm5, %v1654_v7, %v1655_v36  ;;  %vm5033_vm0 = vcmp.lt.s32.totalorder %v5797_v31, 640  ;;  %3066 = vmatprep.mubr.f32.mxu1 %v4826_v24  ;;  %v2821_v28 = vsel %vm1684_vm15, 1.0, %v5790_v48  ;;  %v2830_v21 = vsel %vm1693_vm8, 1.0, %v5790_v48 }
 0x1b5   : > { %v2840_v42 = vsel %vm1703_vm9, 1.0, %v5790_v48  ;;  %v1658_v31 = vrot.slane %v1657_v4, 1  ;;  %2061 = vmatmul.mubr.f32.gmra.mxu0 %v4887_v35  ;;  %v5051_v24 = vadd.f32 %v2811_v38, %v2389_v52  ;;  %v5053_v6 = vadd.f32 %v2821_v28, %v2401_v18 }
 0x1b6   : > { %v2413_v54 = vadd.f32 %v2830_v21, %v4627_v1  ;;  %2066 = vmatprep.mubr.f32.mxu0 %v5790_v48  ;;  %vm5803_vm8 = vcmp.eq.s32.totalorder %v3760_v27, %v4514_v60  ;;  %vm5804_vm9 = vcmp.eq.s32.totalorder %v3774_v40, %v4514_v60  ;;  %v2425_v25 = vadd.f32 %v2840_v42, %v4478_v16 }
 0x1b7   : > { %v2831_v29 = vsel %vm5803_vm8, 1.0, %v5790_v48  ;;  %v2841_v7 = vsel %vm5804_vm9, 1.0, %v5790_v48  ;;  %vm5805_vm15 = vcmp.eq.s32.totalorder %v3780_v22, %v4501_v15  ;;  %vm1659_vm2 = vcmp.lt.s32.totalorder %v1657_v4, %v1658_v31 }
 0x1b8   : > { %v2850_v47 = vsel %vm5805_vm15, 1.0, %v5790_v48  ;;  %v5070_v1 = vadd.f32 %v2831_v29, %v2413_v54  ;;  %vm5806_vm3 = vcmp.eq.s32.totalorder %v3792_v44, %v4501_v15  ;;  %v5080_v58 = vsel %vm1659_vm2, %v1657_v4, %v1658_v31 }
 0x1b9   : > { %v5073_v36 = vadd.f32 %v2850_v47, %v4431_v53  ;;  %v2860_v11 = vsel %vm5806_vm3, 1.0, %v5790_v48  ;;  %v2407_v16 = vadd.f32 %v2825_v50, %v4875_v17  ;;  %v5083_v43 = vadd.f32 %v2841_v7, %v2425_v25  ;;  %2067 = vmatmul.mubr.f32.gmra.mxu0 %v4938_v61 }
 0x1ba   : > { %v5086_v38 = vadd.f32 %v2860_v11, %v4401_v39  ;;  %v2206_v9 = vrot.slane %v5080_v58, %v4506_v12  ;;  %vm1740_vm13 = vcmp.eq.s32.totalorder %v3804_v0, %v5080_v58  ;;  %vm5807_vm10 = vcmp.eq.s32.totalorder %v3757_v57, %v4514_v60  ;;  %2072 = vmatprep.mubr.f32.mxu0 %v5790_v48 }
 0x1bb   : > { %v2826_v53 = vsel %vm5807_vm10, 1.0, %v5790_v48  ;;  %vm5808_vm11 = vcmp.eq.s32.totalorder %v3763_v3, %v4501_v15  ;;  %3034 = vmatprep.subr.msk.mxu1 %vm1740_vm13, %v3152_v34  ;;  %vm5688_vm7 = vcmp.eq.s32.totalorder %v3739_v20, %v5080_v58  ;;  %v2378_v39 = vadd.f32 %v4950_v49, %v2377_v51 }
 0x1bc   : > { %v2835_v17 = vsel %vm5808_vm11, 1.0, %v5790_v48  ;;  %vm1680_vm1 = vcmp.eq.s32.totalorder %v3748_v55, %v5080_v58  ;;  %v2221_v52 = vrot.slane %v2206_v9, %v4506_v12  ;;  %3035 = vmatpush3.msk.msra.mxu1 %vm1740_vm13, %v3152_v34  ;;  %vm1735_vm12 = vcmp.eq.s32.totalorder %v3798_v33, %v5080_v58 }
 0x1bd   : > { %v2419_v50 = vadd.f32 %v2835_v17, %v4848_v45  ;;  %v2802_v49 = vsel %vm5688_vm7, 1.0, %v5790_v48  ;;  %v2817_v45 = vsel %vm1680_vm1, 1.0, %v5790_v48  ;;  %3036 = vmatprep.subr.msk.mxu1 %vm1735_vm12, %v3152_v34  ;;  %v2396_v51 = vadd.f32 %v4980_v26, %v2395_v14  ;;  %2073 = vmatmul.mubr.f32.gmra.mxu0 %v4996_v10 }
 0x1be   : > { %v2260_v12 = vmul.f32 %v4962_v56, %v2802_v49  ;;  %vm1690_vm4 = vcmp.eq.s32.totalorder %v3757_v57, %v5080_v58  ;;  %v2408_v18 = vadd.f32 %v2826_v53, %v2407_v16  ;;  %v2222_v4 = vcombine.low %v4748_v19, %v2221_v52  ;;  %3037 = vmatpush3.msk.msra.mxu1 %vm1735_vm12, %v3152_v34 }
 0x1bf   : > { %vm1730_vm14 = vcmp.eq.s32.totalorder %v3795_v46, %v5080_v58  ;;  %vm1700_vm6 = vcmp.eq.s32.totalorder %v3763_v3, %v5080_v58  ;;  %vm5809_vm5 = vcmp.eq.s32.totalorder %v3763_v3, %v4514_v60  ;;  %v2275_v14 = vmul.f32 %v4962_v56, %v2817_v45 }
 0x1c0   : > { %v2836_v26 = vsel %vm5809_vm5, 1.0, %v5790_v48  ;;  %3038 = vmatprep.subr.msk.mxu1 %vm1730_vm14, %v3152_v34  ;;  %v2379_v19 = vadd.f32 %v2378_v39, %v2260_v12  ;;  %v2827_v28 = vsel %vm1690_vm4, 1.0, %v5790_v48  ;;  %vm5810_vm8 = vcmp.eq.s32.totalorder %v3777_v8, %v4501_v15  ;;  %2227 = vst.msk [vmem:[%s357_s16] sm:$0x1f] %vm5033_vm0, %v2222_v4 }
 0x1c1   : > { %v2845_v21 = vsel %vm5810_vm8, 1.0, %v5790_v48  ;;  %3039 = vmatpush3.msk.msra.mxu1 %vm1730_vm14, %v3152_v34  ;;  %vm1725_vm9 = vcmp.eq.s32.totalorder %v3792_v44, %v5080_v58  ;;  %v2420_v42 = vadd.f32 %v2836_v26, %v2419_v50  ;;  %vm5811_vm15 = vcmp.eq.s32.totalorder %v3777_v8, %v4514_v60 }
 0x1c2   : > { %v5177_v31 = vsel %vm5811_vm15, 1.0, %v5790_v48  ;;  %vm5812_vm2 = vcmp.eq.s32.totalorder %v3780_v22, %v4514_v60  ;;  %2380 = vadd.xlane.f32.xlu1 %v2379_v19  ;;  %3040 = vmatprep.subr.msk.mxu1 %vm1725_vm9, %v3152_v34  ;;  %vm1720_vm0 = vcmp.eq.s32.totalorder %v3785_v13, %v5080_v58  ;;  %vm1710_vm3 = vcmp.eq.s32.totalorder %v3777_v8, %v5080_v58 }
 0x1c3   : > { %v2851_v59 = vsel %vm5812_vm2, 1.0, %v5790_v48  ;;  %v2837_v54 = vsel %vm1700_vm6, 1.0, %v5790_v48  ;;  %vm1675_vm10 = vcmp.eq.s32.totalorder %v3745_v63, %v5080_v58  ;;  %3041 = vmatpush3.msk.msra.mxu1 %vm1725_vm9, %v3152_v34  ;;  %v2285_v29 = vmul.f32 %v4962_v56, %v2827_v28 }
 0x1c4   : > { %vm1695_vm11 = vcmp.eq.s32.totalorder %v3760_v27, %v5080_v58  ;;  %vm1685_vm5 = vcmp.eq.s32.totalorder %v3751_v41, %v5080_v58  ;;  %vm1670_vm8 = vcmp.eq.s32.totalorder %v3742_v23, %v5080_v58  ;;  %3042 = vmatprep.subr.msk.mxu1 %vm1720_vm0, %v3152_v34  ;;  %v2397_v7 = vadd.f32 %v2396_v51, %v2275_v14 }
 0x1c5   : > { %vm1715_vm15 = vcmp.eq.s32.totalorder %v3780_v22, %v5080_v58  ;;  %v2807_v25 = vsel %vm1670_vm8, 1.0, %v5790_v48  ;;  %vm5813_vm2 = vcmp.eq.s32.totalorder %v3792_v44, %v4514_v60  ;;  %3043 = vmatpush3.msk.msra.mxu1 %vm1720_vm0, %v3152_v34  ;;  %vm1705_vm7 = vcmp.eq.s32.totalorder %v3774_v40, %v5080_v58 }
 0x1c6   : > { %v2861_v47 = vsel %vm5813_vm2, 1.0, %v5790_v48  ;;  %v2295_v11 = vmul.f32 %v4962_v56, %v2837_v54  ;;  %v2265_v16 = vmul.f32 %v4962_v56, %v2807_v25  ;;  %v2812_v9 = vsel %vm1675_vm10, 1.0, %v5790_v48  ;;  %2398 = vadd.xlane.f32.xlu1 %v2397_v7  ;;  %3044 = vmatprep.subr.msk.mxu1 %vm1715_vm15, %v3152_v34 }
 0x1c7   : > { %v2847_v53 = vsel %vm1710_vm3, 1.0, %v5790_v48  ;;  %v2270_v17 = vmul.f32 %v4962_v56, %v2812_v9  ;;  %v2822_v39 = vsel %vm1685_vm5, 1.0, %v5790_v48  ;;  %v2832_v50 = vsel %vm1695_vm11, 1.0, %v5790_v48  ;;  %3045 = vmatpush3.msk.msra.mxu1 %vm1715_vm15, %v3152_v34 }
 0x1c8   : > { %v2409_v52 = vadd.f32 %v2408_v18, %v2285_v29  ;;  %v5256_v49 = vadd.f32 %v5028_v30, %v2265_v16  ;;  %v2280_v45 = vmul.f32 %v4962_v56, %v2822_v39  ;;  %v2290_v12 = vmul.f32 %v4962_v56, %v2832_v50  ;;  %3046 = vmatprep.subr.msk.mxu1 %vm1710_vm3, %v3152_v34 }
 0x1c9   : > { %v5265_v51 = vadd.f32 %v5051_v24, %v2270_v17  ;;  %v2842_v18 = vsel %vm1705_vm7, 1.0, %v5790_v48  ;;  %v2852_v30 = vsel %vm1715_vm15, 1.0, %v5790_v48  ;;  %v2438_v4 = vadd.f32 %v2851_v59, %v5073_v36  ;;  %3047 = vmatpush3.msk.msra.mxu1 %vm1710_vm3, %v3152_v34 }
 0x1ca   : > { %v5281_v24 = vadd.f32 %v5053_v6, %v2280_v45  ;;  %v5284_v26 = vadd.f32 %v5070_v1, %v2290_v12  ;;  %v2300_v19 = vmul.f32 %v4962_v56, %v2842_v18  ;;  %v2310_v14 = vmul.f32 %v4962_v56, %v2852_v30  ;;  %2410 = vadd.xlane.f32.xlu1 %v2409_v52 }
 0x1cb   : > { %3048 = vmatprep.subr.msk.mxu1 %vm1705_vm7, %v3152_v34  ;;  %v2431_v22 = vadd.f32 %v2845_v21, %v4459_v62  ;;  %v2862_v8 = vsel %vm1725_vm9, 1.0, %v5790_v48  ;;  %v2450_v6 = vadd.f32 %v2861_v47, %v5086_v38  ;;  %vm5814_vm3 = vcmp.eq.s32.totalorder %v3798_v33, %v4501_v15 }
 0x1cc   : > { %v2870_v1 = vsel %vm5814_vm3, 1.0, %v5790_v48  ;;  %3049 = vmatpush3.msk.msra.mxu1 %vm1705_vm7, %v3152_v34  ;;  %v5307_v36 = vadd.f32 %v5083_v43, %v2300_v19  ;;  %v5309_v62 = vadd.f32 %v2438_v4, %v2310_v14  ;;  %v2320_v44 = vmul.f32 %v4962_v56, %v2862_v8 }
 0x1cd   : > { %v2872_v38 = vsel %vm1735_vm12, 1.0, %v5790_v48  ;;  %3050 = vmatprep.subr.msk.mxu1 %vm1700_vm6, %v3152_v34  ;;  %v2421_v28 = vadd.f32 %v2420_v42, %v2295_v11  ;;  %v2305_v40 = vmul.f32 %v4962_v56, %v2847_v53  ;;  %v2461_v21 = vadd.f32 %v2870_v1, %v4376_v2 }
 0x1ce   : > { %v2330_v43 = vmul.f32 %v4962_v56, %v2872_v38  ;;  %3051 = vmatpush3.msk.msra.mxu1 %vm1700_vm6, %v3152_v34  ;;  %vm5815_vm7 = vcmp.eq.s32.totalorder %v3785_v13, %v4501_v15  ;;  %v2857_v42 = vsel %vm1720_vm0, 1.0, %v5790_v48  ;;  %v5335_v54 = vadd.f32 %v2450_v6, %v2320_v44  ;;  %v3107_v6 = vld [vmem:[%s3225_s10 + $0x8] sm:$0xff] }
 0x1cf   : > { %v2855_v59 = vsel %vm5815_vm7, 1.0, %v5790_v48  ;;  %vm5816_vm12 = vcmp.eq.s32.totalorder %v3798_v33, %v4514_v60  ;;  %2422 = vadd.xlane.f32.xlu1 %v2421_v28  ;;  %3052 = vmatprep.subr.msk.mxu1 %vm1695_vm11, %v3152_v34  ;;  %v2432_v3 = vadd.f32 %v5177_v31, %v2431_v22  ;;  %v2315_v25 = vmul.f32 %v4962_v56, %v2857_v42  ;;  %v3106_v22 = vld [vmem:[%s3225_s10] sm:$0xff]  ;;  %v3108_v28 = vld [vmem:[%s3225_s10 + $0x10] sm:$0xff] }
 0x1d0   : > { %v2871_v2 = vsel %vm5816_vm12, 1.0, %v5790_v48  ;;  %v2443_v29 = vadd.f32 %v2855_v59, %v4412_v37  ;;  %3053 = vmatpush3.msk.msra.mxu1 %vm1695_vm11, %v3152_v34  ;;  %vm5817_vm6 = vcmp.eq.s32.totalorder %v3785_v13, %v4514_v60  ;;  %vm5818_vm9 = vcmp.eq.s32.totalorder %v3795_v46, %v4501_v15  ;;  %v3109_v59 = vld [vmem:[%s3225_s10 + $0x18] sm:$0xff] }
 0x1d1   : > { %v2462_v7 = vadd.f32 %v2871_v2, %v2461_v21  ;;  %3054 = vmatprep.subr.msk.mxu1 %vm1690_vm4, %v3152_v34  ;;  %v2433_v33 = vadd.f32 %v2432_v3, %v2305_v40  ;;  %v2856_v27 = vsel %vm5817_vm6, 1.0, %v5790_v48  ;;  %v2865_v37 = vsel %vm5818_vm9, 1.0, %v5790_v48 }
 0x1d2   : > { %3055 = vmatpush3.msk.msra.mxu1 %vm1690_vm4, %v3152_v34  ;;  %v2867_v31 = vsel %vm1730_vm14, 1.0, %v5790_v48  ;;  %v2444_v57 = vadd.f32 %v2856_v27, %v2443_v29  ;;  %v2455_v13 = vadd.f32 %v2865_v37, %v4382_v32  ;;  %vm5819_vm4 = vcmp.eq.s32.totalorder %v3795_v46, %v4514_v60  ;;  %v3111_v37 = vld [vmem:[%s3225_s10 + $0x28] sm:$0xff] }
 0x1d3   : > { %v5356_v47 = vadd.f32 %v2462_v7, %v2330_v43  ;;  %2434 = vadd.xlane.f32.xlu1 %v2433_v33  ;;  %3056 = vmatprep.subr.msk.mxu1 %vm1685_vm5, %v3152_v34  ;;  %v2325_v11 = vmul.f32 %v4962_v56, %v2867_v31  ;;  %v2866_v32 = vsel %vm5819_vm4, 1.0, %v5790_v48  ;;  %v2877_v41 = vsel %vm1740_vm13, 1.0, %v5790_v48  ;;  %v3110_v33 = vld [vmem:[%s3225_s10 + $0x20] sm:$0xff] }
 0x1d4   : > { %3057 = vmatpush3.msk.msra.mxu1 %vm1685_vm5, %v3152_v34  ;;  %v2445_v15 = vadd.f32 %v2444_v57, %v2315_v25  ;;  %v2456_v16 = vadd.f32 %v2866_v32, %v2455_v13  ;;  %v2335_v55 = vmul.f32 %v4962_v56, %v2877_v41  ;;  %vm5820_vm13 = vcmp.eq.s32.totalorder %v3739_v20, %v5080_v58 }
 0x1d5   : > { %3058 = vmatprep.subr.msk.mxu1 %vm1680_vm1, %v3152_v34  ;;  %vm2472_vm14 = vcmask 7168  }
 0x1d6   : > { %3059 = vmatpush3.msk.msra.mxu1 %vm1680_vm1, %v3152_v34  ;;  %v2457_v46 = vadd.f32 %v2456_v16, %v2325_v11  ;;  %vm5821_vm1 = vmmov %vm5820_vm13  ;;  %v2469_v63 = vadd.f32 %v5007_v5, %v2335_v55  ;;  %v3113_v16 = vld [vmem:[%s3225_s10 + $0x38] sm:$0xff] }
 0x1d7   : > { %2446 = vadd.xlane.f32.xlu1 %v2445_v15  ;;  %3060 = vmatprep.subr.msk.mxu1 %vm1675_vm10, %v3152_v34  ;;  %v3112_v15 = vld [vmem:[%s3225_s10 + $0x30] sm:$0xff] }
 0x1d8   : > { %3061 = vmatpush3.msk.msra.mxu1 %vm1675_vm10, %v3152_v34 }
 0x1d9   : > { %3062 = vmatprep.subr.msk.mxu1 %vm1670_vm8, %v3152_v34 }
 0x1da   : > { %3063 = vmatpush3.msk.msra.mxu1 %vm1670_vm8, %v3152_v34 }
 0x1db   : > { %2458 = vadd.xlane.f32.xlu1 %v2457_v46  ;;  %3064 = vmatprep.subr.msk.mxu1 %vm5820_vm13, %v3152_v34 }
 0x1dc   : > { %3065 = vmatpush3.msk.msra.mxu1 %vm5821_vm1, %v3152_v34 }
 0x1dd   : > { %3067 = vmatmul.mubr.f32.vlgmr.msra.gmra.mxu1 %v4887_v35 }
 0x1de   : > { %3069 = vmatprep.mubr.f32.mxu1 %v4938_v61 }
 0x1df   : > { %2470 = vadd.xlane.f32.xlu1 %v2469_v63  ;;  %v3114_v63 = vld [vmem:[%s3225_s10 + $0x48] sm:$0xff] }
 0x1e1   : > { %3070 = vmatmul.mubr.f32.gmra.mxu1 %v4996_v10 }
 0x24b   : > { %v2381_v20 = vpop.xlane.xlu1 %2380 }
 0x24c   : > { %2473 = vst.msk [vmem:[%s5433_s20] sm:$0xff] %vm2472_vm14, %v2381_v20 }
 0x24f   : > { %v2399_v23 = vpop.xlane.xlu1 %2398 }
 0x250   : > { %2476 = vst.msk [vmem:[%s5433_s20 + $0x18] sm:$0xff] %vm2472_vm14, %v2399_v23 }
 0x253   : > { %v2411_v0 = vpop.xlane.xlu1 %2410 }
 0x254   : > { %2478 = vst.msk [vmem:[%s5433_s20 + $0x28] sm:$0xff] %vm2472_vm14, %v2411_v0 }
 0x258   : > { %v2423_v48 = vpop.xlane.xlu1 %2422 }
 0x259   : > { %2480 = vst.msk [vmem:[%s5433_s20 + $0x38] sm:$0xff] %vm2472_vm14, %v2423_v48 }
 0x25c   : > { %v2435_v34 = vpop.xlane.xlu1 %2434 }
 0x25d   : > { %2482 = vst.msk [vmem:[%s5433_s20 + $0x48] sm:$0xff] %vm2472_vm14, %v2435_v34 }
 0x260   : > { %v2447_v60 = vpop.xlane.xlu1 %2446 }
 0x261   : > { %2484 = vst.msk [vmem:[%s5433_s20 + $0x58] sm:$0xff] %vm2472_vm14, %v2447_v60  ;;  %v3115_v60 = vld [vmem:[%s3225_s10 + $0x40] sm:$0xff] }
 0x264   : > { %v2459_v35 = vpop.xlane.xlu1 %2458 }
 0x265   : > { %2486 = vst.msk [vmem:[%s5433_s20 + $0x68] sm:$0xff] %vm2472_vm14, %v2459_v35 }
 0x267   : > { %v1967_v10 = vpop.f32.mrf.mxu1 }
 0x268   : > { %v2471_v61 = vpop.xlane.xlu1 %2470  ;;  %2164 = vst [vmem:[%s5454_s23] sm:$0xff] %v1967_v10  ;;  %v2336_v8 = vsub.f32 %v1967_v10, %v3106_v22 }
 0x269   : > { %2488 = vst.msk [vmem:[%s5433_s20 + $0x78] sm:$0xff] %vm2472_vm14, %v2471_v61  ;;  %v1969_v5 = vpop.f32.mrf.mxu1 }
 0x26a   : > { %2165 = vst [vmem:[%s5454_s23 + $0x8] sm:$0xff] %v1969_v5  ;;  %v2337_v1 = vsub.f32 %v1969_v5, %v3107_v6  ;;  %v2489_v44 = vmul.f32 %v2336_v8, %v2336_v8  ;;  %v3116_v5 = vld [vmem:[%s3225_s10 + $0x50] sm:$0xff]  ;;  %v3118_v6 = vld [vmem:[%s3225_s10 + $0x60] sm:$0xff] }
 0x26b   : > { %v1973_v58 = vpop.f32.mrf.mxu1 }
 0x26c   : > { %2169 = vst [vmem:[%s5454_s23 + $0x28] sm:$0xff] %v1973_v58  ;;  %v2490_v38 = vmul.f32 %v2337_v1, %v2337_v1  ;;  %v2341_v31 = vsub.f32 %v1973_v58, %v3111_v37 }
 0x26d   : > { %v1975_v9 = vpop.f32.mrf.mxu1 }
 0x26e   : > { %2170 = vst [vmem:[%s5454_s23 + $0x30] sm:$0xff] %v1975_v9  ;;  %v2509_v43 = vadd.f32 %v2490_v38, %v2489_v44  ;;  %v2342_v11 = vsub.f32 %v1975_v9, %v3112_v15  ;;  %v2494_v55 = vmul.f32 %v2341_v31, %v2341_v31  ;;  %v3119_v38 = vld [vmem:[%s3225_s10 + $0x70] sm:$0xff]  ;;  %v3123_v31 = vld [vmem:[%s3225_s10 + $0x88] sm:$0xff]  ;;  %v3124_v15 = vld [vmem:[%s3225_s10 + $0x98] sm:$0xff] }
 0x26f   : > { %v5462_v53 = vpop.f32.mrf.mxu1 }
 0x270   : > { %2174 = vst [vmem:[%s5454_s23 + $0x50] sm:$0xff] %v5462_v53  ;;  %v2495_v0 = vmul.f32 %v2342_v11, %v2342_v11  ;;  %v2346_v58 = vsub.f32 %v5462_v53, %v3116_v5 }
 0x271   : > { %v5466_v17 = vpop.f32.mrf.mxu1  ;;  %v2056_v39 = vpop.f32.mrf.mxu0 }
 0x272   : > { %2175 = vst [vmem:[%s5454_s23 + $0x58] sm:$0xff] %v5466_v17  ;;  %2166 = vst [vmem:[%s5454_s23 + $0x10] sm:$0xff] %v2056_v39  ;;  %v2338_v40 = vsub.f32 %v2056_v39, %v3108_v28  ;;  %v2499_v44 = vmul.f32 %v2346_v58, %v2346_v58 }
 0x273   : > { %v5471_v50 = vpop.f32.mrf.mxu1  ;;  %v2058_v52 = vpop.f32.mrf.mxu0 }
 0x274   : > { %2179 = vst [vmem:[%s5454_s23 + $0x78] sm:$0xff] %v5471_v50  ;;  %2167 = vst [vmem:[%s5454_s23 + $0x18] sm:$0xff] %v2058_v52  ;;  %v2491_v21 = vmul.f32 %v2338_v40, %v2338_v40  ;;  %v2339_v42 = vsub.f32 %v2058_v52, %v3109_v59  ;;  %v3117_v52 = vld [vmem:[%s3225_s10 + $0x58] sm:$0xff] }
 0x275   : > { %v5476_v45 = vpop.f32.mrf.mxu1  ;;  %v2062_v12 = vpop.f32.mrf.mxu0 }
 0x276   : > { %2180 = vst [vmem:[%s5454_s23 + $0x80] sm:$0xff] %v5476_v45  ;;  %2171 = vst [vmem:[%s5454_s23 + $0x38] sm:$0xff] %v2062_v12  ;;  %v2510_v29 = vadd.f32 %v2509_v43, %v2491_v21  ;;  %v2492_v7 = vmul.f32 %v2339_v42, %v2339_v42  ;;  %v2343_v46 = vsub.f32 %v2062_v12, %v3113_v16  ;;  %v3120_v21 = vld [vmem:[%s3225_s10 + $0x68] sm:$0xff] }
 0x277   : > { %v2064_v18 = vpop.f32.mrf.mxu0  ;;  %v2347_v12 = vsub.f32 %v5466_v17, %v3117_v52 }
 0x278   : > { %2172 = vst [vmem:[%s5454_s23 + $0x40] sm:$0xff] %v2064_v18  ;;  %v2511_v32 = vadd.f32 %v2510_v29, %v2492_v7  ;;  %v2496_v48 = vmul.f32 %v2343_v46, %v2343_v46  ;;  %v2344_v35 = vsub.f32 %v2064_v18, %v3115_v60  ;;  %v3122_v7 = vld [vmem:[%s3225_s10 + $0x80] sm:$0xff] }
 0x279   : > { %v2068_v30 = vpop.f32.mrf.mxu0  ;;  %v2500_v40 = vmul.f32 %v2347_v12, %v2347_v12 }
 0x27a   : > { %2176 = vst [vmem:[%s5454_s23 + $0x60] sm:$0xff] %v2068_v30  ;;  %v2497_v39 = vmul.f32 %v2344_v35, %v2344_v35  ;;  %v2348_v1 = vsub.f32 %v2068_v30, %v3118_v6 }
 0x27b   : > { %v5483_v4 = vpop.f32.mrf.mxu0 }
 0x27c   : > { %2177 = vst [vmem:[%s5454_s23 + $0x68] sm:$0xff] %v5483_v4  ;;  %v2501_v43 = vmul.f32 %v2348_v1, %v2348_v1  ;;  %v2349_v59 = vsub.f32 %v5483_v4, %v3120_v21 }
 0x27d   : > { %v5487_v19 = vpop.f32.mrf.mxu0 }
 0x27e   : > { %2181 = vst [vmem:[%s5454_s23 + $0x88] sm:$0xff] %v5487_v19  ;;  %v2502_v29 = vmul.f32 %v2349_v59, %v2349_v59 }
 0x27f   : > { %v5491_v14 = vpop.f32.mrf.mxu0 }
 0x280   : > { %2182 = vst [vmem:[%s5454_s23 + $0x90] sm:$0xff] %v5491_v14 }
 0x29d   : > { %v3068_v2 = vpop.f32.mrf.mxu1 }
 0x29e   : > { %2173 = vst [vmem:[%s5454_s23 + $0x48] sm:$0xff] %v3068_v2  ;;  %v2345_v20 = vsub.f32 %v3068_v2, %v3114_v63  ;;  %v3121_v2 = vld [vmem:[%s3225_s10 + $0x78] sm:$0xff] }
 0x29f   : > { %v2145_v3 = vpop.f32.mrf.mxu1 }
 0x2a0   : > { %2168 = vst [vmem:[%s5454_s23 + $0x20] sm:$0xff] %v2145_v3  ;;  %v2340_v25 = vsub.f32 %v2145_v3, %v3110_v33  ;;  %v2365_v61 = vmul.f32 %v4962_v56, %v2345_v20  ;;  %v2351_v3 = vsub.f32 %v5471_v50, %v3121_v2  ;;  %v2352_v33 = vsub.f32 %v5476_v45, %v3122_v7  ;;  %v3125_v50 = vld [vmem:[%s3225_s10 + $0x90] sm:$0xff] }
 0x2a1   : > { %v5502_v27 = vpop.f32.mrf.mxu1  ;;  %v2354_v46 = vsub.f32 %v5491_v14, %v3125_v50 }
 0x2a2   : > { %v2360_v57 = vmul.f32 %v4962_v56, %v2340_v25  ;;  %2183 = vst [vmem:[%s5454_s23 + $0x98] sm:$0xff] %v5502_v27  ;;  %v2498_v22 = vmul.f32 %v2365_v61, %v2365_v61  ;;  %v2355_v4 = vsub.f32 %v5502_v27, %v3124_v15 }
 0x2a3   : > { %v2155_v13 = vpop.f32.mrf.mxu1  ;;  %v2507_v20 = vmul.f32 %v2354_v46, %v2354_v46 }
 0x2a4   : > { %v2493_v41 = vmul.f32 %v2360_v57, %v2360_v57  ;;  %2178 = vst [vmem:[%s5454_s23 + $0x70] sm:$0xff] %v2155_v13  ;;  %v2350_v28 = vsub.f32 %v2155_v13, %v3119_v38  ;;  %v2353_v57 = vsub.f32 %v5487_v19, %v3123_v31  ;;  %v2504_v13 = vmul.f32 %v2351_v3, %v2351_v3 }
 0x2a6   : > { %v2512_v23 = vadd.f32 %v2511_v32, %v2493_v41  ;;  %v2370_v17 = vmul.f32 %v4962_v56, %v2350_v28  ;;  %v2505_v32 = vmul.f32 %v2352_v33, %v2352_v33  ;;  %v2506_v16 = vmul.f32 %v2353_v57, %v2353_v57 }
 0x2a8   : > { %v2513_v34 = vadd.f32 %v2512_v23, %v2494_v55  ;;  %v2503_v37 = vmul.f32 %v2370_v17, %v2370_v17  ;;  %v2375_v55 = vmul.f32 %v4962_v56, %v2355_v4 }
 0x2aa   : > { %v2514_v10 = vadd.f32 %v2513_v34, %v2495_v0  ;;  %v2508_v0 = vmul.f32 %v2375_v55, %v2375_v55 }
 0x2ac   : > { %v2515_v9 = vadd.f32 %v2514_v10, %v2496_v48 }
 0x2ae   : > { %v2516_v8 = vadd.f32 %v2515_v9, %v2497_v39 }
 0x2b0   : > { %v2517_v18 = vadd.f32 %v2516_v8, %v2498_v22 }
 0x2b2   : > { %v2518_v53 = vadd.f32 %v2517_v18, %v2499_v44 }
 0x2b4   : > { %v2519_v42 = vadd.f32 %v2518_v53, %v2500_v40 }
 0x2b6   : > { %v2520_v30 = vadd.f32 %v2519_v42, %v2501_v43 }
 0x2b8   : > { %v2521_v25 = vadd.f32 %v2520_v30, %v2502_v29 }
 0x2ba   : > { %v2522_v11 = vadd.f32 %v2521_v25, %v2503_v37 }
 0x2bc   : > { %v2523_v41 = vadd.f32 %v2522_v11, %v2504_v13 }
 0x2be   : > { %v2524_v63 = vadd.f32 %v2523_v41, %v2505_v32 }
 0x2c0   : > { %v2525_v45 = vadd.f32 %v2524_v63, %v2506_v16 }
 0x2c2   : > { %v2526_v23 = vadd.f32 %v2525_v45, %v2507_v20 }
 0x2c4   : > { %v2527_v19 = vadd.f32 %v2526_v23, %v2508_v0 }
 0x2c6   : > { %2528 = vadd.xlane.f32.xlu0 %v2527_v19 }
 0x2ca   : > { %2386 = vadd.xlane.f32.xlu0 %v5256_v49 }
 0x2ce   : > { %2392 = vadd.xlane.f32.xlu0 %v5265_v51 }
 0x2d2   : > { %2404 = vadd.xlane.f32.xlu0 %v5281_v24 }
 0x2d6   : > { %2416 = vadd.xlane.f32.xlu0 %v5284_v26 }
 0x2da   : > { %2428 = vadd.xlane.f32.xlu0 %v5307_v36 }
 0x2de   : > { %2440 = vadd.xlane.f32.xlu0 %v5309_v62 }
 0x2e2   : > { %2452 = vadd.xlane.f32.xlu0 %v5335_v54 }
 0x2e6   : > { %2464 = vadd.xlane.f32.xlu0 %v5356_v47 }
 0x34f   : > { %v2529_v56 = vpop.xlane.xlu0 %2528 }
 0x350   : > { %v2530_v14 = vrot.slane %v2529_v56, 4 }
 0x352   : > { %v2531_v49 = vadd.f32 %v2530_v14, %v2529_v56 }
 0x353   : > { %v2387_v27 = vpop.xlane.xlu0 %2386 }
 0x354   : > { %v2532_v51 = vrot.slane %v2531_v49, 2  ;;  %2474 = vst.msk [vmem:[%s5433_s20 + $0x8] sm:$0xff] %vm2472_vm14, %v2387_v27 }
 0x356   : > { %v2533_v24 = vadd.f32 %v2532_v51, %v2531_v49 }
 0x357   : > { %v2393_v26 = vpop.xlane.xlu0 %2392 }
 0x358   : > { %2475 = vst.msk [vmem:[%s5433_s20 + $0x10] sm:$0xff] %vm2472_vm14, %v2393_v26  ;;  %v2534_v36 = vrot.slane %v2533_v24, 1 }
 0x35a   : > { %v2535_v62 = vadd.f32 %v2534_v36, %v2533_v24 }
 0x35b   : > { %v2405_v54 = vpop.xlane.xlu0 %2404 }
 0x35c   : > { %2477 = vst.msk [vmem:[%s5433_s20 + $0x20] sm:$0xff] %vm2472_vm14, %v2405_v54 }
 0x35d   : > { %3074 = vpush %v2535_v62 }
 0x35f   : > { %v2417_v47 = vpop.xlane.xlu0 %2416 }
 0x360   : > { %2479 = vst.msk [vmem:[%s5433_s20 + $0x30] sm:$0xff] %vm2472_vm14, %v2417_v47 }
 0x363   : > { %v2429_v48 = vpop.xlane.xlu0 %2428 }
 0x364   : > { %2481 = vst.msk [vmem:[%s5433_s20 + $0x40] sm:$0xff] %vm2472_vm14, %v2429_v48 }
 0x367   : > { %v2441_v34 = vpop.xlane.xlu0 %2440 }
 0x368   : > { %2483 = vst.msk [vmem:[%s5433_s20 + $0x50] sm:$0xff] %vm2472_vm14, %v2441_v34 }
 0x36b   : > { %v2453_v60 = vpop.xlane.xlu0 %2452 }
 0x36c   : > { %2485 = vst.msk [vmem:[%s5433_s20 + $0x60] sm:$0xff] %vm2472_vm14, %v2453_v60 }
 0x36f   : > { %v2465_v35 = vpop.xlane.xlu0 %2464 }
 0x370   : > { %2487 = vst.msk [vmem:[%s5433_s20 + $0x70] sm:$0xff] %vm2472_vm14, %v2465_v35 }
 0x38e   : > { %s3075_s8 = spop %3074 }
 0x38f   : > { %v2537_v61 = vstv %s3075_s8 }
 0x390   : > { %2538 = vst.msk [vmem:[%s370_s30] sm:$0xff] %vm2472_vm14, %v2537_v61 }
 0x391 PF: > { %s18_s26 = sadd.s32 1, %s3148_s26   ;;  %s5822_s24 = smov %s3144_s25 }
 0x392   : > { %p15_p5 = scmp.ge.s32.totalorder %s18_s26, 4   ;;  %s5823_s25 = smov %s5825_s27 }
 0x394   :  { %17 = sbr.rel (!%p15_p5) target bundleno = 2 (0x2), region = 102 }

</bundles_post_ra>
